<compile_context>
chip_gen: v6e
topology: v6e:2x2x1
jax: 0.10.0
libtpu: 0.0.40
codegen_flags: <defaults>
</compile_context>

<pallas_src>
import jax
import jax.numpy as jnp
from jax.experimental import pallas as pl
from jax.experimental.pallas import tpu as pltpu


# ---------------------------------------------------------------------------
# Kernel
# ---------------------------------------------------------------------------
def _attn_pool_kernel(x_ref, pos_ref, wq_ref, wk_ref, wv_ref,
                      bq_ref, bk_ref, bv_ref, m_ref, mt_ref, o_ref):
    B, L, E = x_ref.shape                     # B = batch tile, L = seq, E = embed
    H = m_ref.shape[1]                        # number of heads
    cd = wq_ref.dtype                         # MXU compute dtype (f32 or bf16)
    md = m_ref.dtype                          # dtype of head-membership matmuls

    xb = x_ref[...]                                               # (B, L, E)
    # class token = mean over the sequence + positional embedding (kept f32)
    class_tok = (jnp.sum(xb.astype(jnp.float32), axis=1) * (1.0 / L)
                 + pos_ref[...])                                  # (B, E) f32

    cls_c = class_tok.astype(cd)                                  # (B, E)
    # Flatten batch*seq into the matmul row axis (L % 8 == 0 -> layout preserving).
    x_rows = xb.reshape(B * L, E).astype(cd)                      # (B*L, E)
    # Single row slab for the k/v projections so Wk/Wv stream through the MXU
    # exactly once per grid step (concat boundary is sublane-aligned: B % 8 == 0).
    rows = jnp.concatenate([cls_c, x_rows], axis=0)               # (B*(L+1), E)

    wq = wq_ref[...]
    wk = wk_ref[...]
    wv = wv_ref[...]
    bq = bq_ref[...]
    bk = bk_ref[...]
    bv = bv_ref[...]

    # Projections; attention scale pre-folded into wq/bq; f32 accumulation.
    q     = jnp.dot(cls_c, wq, preferred_element_type=jnp.float32) + bq   # (B, E)
    k_all = jnp.dot(rows,  wk, preferred_element_type=jnp.float32) + bk   # (B*(L+1), E)
    v_all = jnp.dot(rows,  wv, preferred_element_type=jnp.float32) + bv   # (B*(L+1), E)

    k_cls = k_all[:B]                                             # (B, E)  (aligned slice)
    v_cls = v_all[:B]
    k_x3  = k_all[B:].reshape(B, L, E)                            # (B, L, E)
    v_x3  = v_all[B:].reshape(B, L, E)

    # Per-head reduction via dense head-membership matmuls (M: (E,H), M^T: (H,E)),
    # built once on the host.  Operands cast to M's dtype (bf16 path -> native
    # single-pass MXU); accumulation stays f32.
    M  = m_ref[...]                                               # (E, H)
    MT = mt_ref[...]                                              # (H, E)

    # logits[b, s, h] = sum_{e in head h} q[b, e] * k[b, s, e]   (scale pre-folded)
    logits_x = jnp.dot((k_x3 * q[:, None, :]).reshape(B * L, E).astype(md), M,
                       preferred_element_type=jnp.float32).reshape(B, L, H)
    logits_cls = jnp.dot((k_cls * q).astype(md), M,
                         preferred_element_type=jnp.float32)      # (B, H)

    # Unnormalized softmax over the (L+1) positions (class token + L tokens), f32.
    m_max = jnp.maximum(logits_cls, jnp.max(logits_x, axis=1))               # (B, H)
    p_cls = jnp.exp(logits_cls - m_max)                                      # (B, H)
    p_x   = jnp.exp(logits_x - m_max[:, None, :])                            # (B, L, H)
    denom = p_cls + jnp.sum(p_x, axis=1)                                     # (B, H)

    # Expand unnormalized per-head weights to per-channel via M^T, reduce over
    # positions, then apply the deferred normalization with one reciprocal.
    p_cls_e = jnp.dot(p_cls.astype(md), MT,
                      preferred_element_type=jnp.float32)                    # (B, E)
    p_x_e   = jnp.dot(p_x.reshape(B * L, H).astype(md), MT,
                      preferred_element_type=jnp.float32).reshape(B, L, E)   # (B, L, E)
    r_e     = jnp.dot(pl.reciprocal(denom, approx=False).astype(md), MT,
                      preferred_element_type=jnp.float32)                    # (B, E)

    out = (p_cls_e * v_cls + jnp.sum(p_x_e * v_x3, axis=1)) * r_e            # (B, E)
    o_ref[...] = out.astype(o_ref.dtype)


# ---------------------------------------------------------------------------
# Host-side prep & tiling heuristics
# ---------------------------------------------------------------------------
def prepare_attention_pooling_params(params, num_heads, compute_dtype=jnp.float32):
    """One-time host-side prep: transpose weights, fold the attention scale into
    the q projection, build the head-membership matrices, cast for the MXU.

    Note: torch applies 1/dph**0.25 to q and k separately; folding 1/sqrt(dph)
    into Wq/bq is mathematically equivalent (logits stay f32, reorders rounding
    only).  In the bf16 path the class token is cast to bf16 before the
    projections (covered by the bf16 tolerance)."""
    E = params["wq"].shape[0]
    dph = E // num_heads
    scale = 1.0 / (dph ** 0.5)

    prepared = {
        "pos": params["positional_embedding"].astype(jnp.float32).reshape(1, E),
        "wq_t": (params["wq"].T * scale).astype(compute_dtype),   # (in, out), scaled
        "wk_t": params["wk"].T.astype(compute_dtype),
        "wv_t": params["wv"].T.astype(compute_dtype),
        "bq": (params["bq"] * scale).astype(jnp.float32).reshape(1, E),
        "bk": params["bk"].astype(jnp.float32).reshape(1, E),
        "bv": params["bv"].astype(jnp.float32).reshape(1, E),
    }
    # Head membership: M[e, h] = 1 iff channel e belongs to head h (exact in bf16).
    head_of = jnp.arange(E, dtype=jnp.int32) // dph
    M = (head_of[:, None] == jnp.arange(num_heads, dtype=jnp.int32)[None, :]
         ).astype(jnp.float32)
    prepared["m"] = M.astype(compute_dtype)                       # (E, H)
    prepared["mt"] = M.T.astype(compute_dtype)                    # (H, E)
    return prepared


def _tpu_kind():
    try:
        return jax.devices()[0].device_kind.lower()
    except Exception:
        return ""


def _vmem_limit_for(kind):
    if "v7" in kind:
        return 48 * 1024 * 1024     # v7x: 64 MiB physical per TC -> leave headroom
    return 96 * 1024 * 1024         # v5e / v6e: 128 MiB physical


def _vmem_estimate(b_tile, L, E, H, weight_bytes):
    """Rough per-step VMEM footprint (bytes) for the tile picker."""
    f32 = 4
    rows = b_tile * (L + 1)
    x_tile   = 2 * b_tile * L * E * f32                    # double-buffered input
    out_tile = 2 * b_tile * E * f32                        # double-buffered output
    weights  = 3 * E * E * weight_bytes + 4 * E * f32      # single-buffered consts
    mmats    = 2 * E * H * weight_bytes
    interm   = (3 * rows * E + 3 * b_tile * L * E + 3 * b_tile * L * H) * f32
    return x_tile + out_tile + weights + mmats + interm


def _pick_batch_tile(bs, L, E, H, weight_bytes, vmem_budget, prefer_even_steps):
    """Largest multiple-of-8 tile that divides bs and fits the VMEM budget,
    preferring >=2 grid steps (and an even step count on megacore parts)."""
    cands = [c for c in (256, 128, 64, 32, 16, 8) if c <= bs and bs % c == 0]
    fits = [c for c in cands
            if _vmem_estimate(c, L, E, H, weight_bytes) <= vmem_budget]
    for c in fits:
        steps = bs // c
        if steps >= 2 and (not prefer_even_steps or steps % 2 == 0):
            return c
    for c in fits:
        if bs // c >= 2:
            return c
    if fits:
        return fits[0]
    return bs   # tiny / ragged batch: one block covering the full batch dim


def _const_block_spec(shape):
    """Constant-index block: single-buffer (Buffered(1)) to halve its VMEM
    footprint — its DMA happens once, double-buffering hides nothing."""
    index_map = lambda b: (0,) * len(shape)
    try:
        return pl.BlockSpec(shape, index_map, pipeline_mode=pl.Buffered(1))
    except TypeError:            # older jax without pipeline_mode support
        return pl.BlockSpec(shape, index_map)


# ---------------------------------------------------------------------------
# Wrapper
# ---------------------------------------------------------------------------
def attention_pooling(x, prepared, *, b_tile=None, vmem_limit_bytes=None):
    """x: (bs, L, E) -> (bs, E).  x may be f32 or bf16 (accumulation stays f32)."""
    bs, L, E = x.shape
    assert L % 8 == 0, (
        f"seq length {L} must be a multiple of 8 (pad the sequence); the "
        f"(B,L,E)->(B*L,E) flatten relies on it being layout-preserving")
    H = prepared["m"].shape[1]
    kind = _tpu_kind()
    if vmem_limit_bytes is None:
        vmem_limit_bytes = _vmem_limit_for(kind)
    weight_bytes = jnp.dtype(prepared["wq_t"].dtype).itemsize
    if b_tile is None:
        b_tile = _pick_batch_tile(bs, L, E, H, weight_bytes,
                                  vmem_budget=vmem_limit_bytes,
                                  prefer_even_steps=("v7" in kind))
    assert bs % b_tile == 0, f"batch {bs} not divisible by tile {b_tile}"

    return pl.pallas_call(
        _attn_pool_kernel,
        out_shape=jax.ShapeDtypeStruct((bs, E), x.dtype),
        grid=(bs // b_tile,),
        in_specs=[
            pl.BlockSpec((b_tile, L, E), lambda b: (b, 0, 0)),   # x tile (pipelined)
            _const_block_spec((1, E)),                           # positional embedding
            _const_block_spec((E, E)),                           # Wq^T (scale folded)
            _const_block_spec((E, E)),                           # Wk^T
            _const_block_spec((E, E)),                           # Wv^T
            _const_block_spec((1, E)),                           # bq (scale folded)
            _const_block_spec((1, E)),                           # bk
            _const_block_spec((1, E)),                           # bv
            _const_block_spec((E, H)),                           # head-membership M
            _const_block_spec((H, E)),                           # M^T
        ],
        out_specs=pl.BlockSpec((b_tile, E), lambda b: (b, 0)),
        compiler_params=pltpu.CompilerParams(
            dimension_semantics=("parallel",),
            vmem_limit_bytes=vmem_limit_bytes,
        ),
    )(x, prepared["pos"], prepared["wq_t"], prepared["wk_t"], prepared["wv_t"],
      prepared["bq"], prepared["bk"], prepared["bv"],
      prepared["m"], prepared["mt"])


# ---------------------------------------------------------------------------
# Pure-JAX reference (mirrors the PyTorch forward)
# ---------------------------------------------------------------------------
def attention_pooling_ref(x, params, num_heads):
    bs, L, E = x.shape
    dph = E // num_heads
    pos = params["positional_embedding"]
    class_tok = jnp.mean(x, axis=1, keepdims=True) + pos             # (bs, 1, E)
    x_cat = jnp.concatenate([class_tok, x], axis=1)                  # (bs, L+1, E)

    def lin(a, w, b):   # PyTorch Linear: a @ W.T + b
        return jnp.einsum('bse,oe->bso', a, w) + b

    q = lin(class_tok, params["wq"], params["bq"])                   # (bs, 1, E)
    k = lin(x_cat, params["wk"], params["bk"])                       # (bs, L+1, E)
    v = lin(x_cat, params["wv"], params["bv"])

    def split_heads(t):  # (bs, S, E) -> (bs, H, S, dph)
        return t.reshape(bs, -1, num_heads, dph).transpose(0, 2, 1, 3)

    qh, kh, vh = split_heads(q), split_heads(k), split_heads(v)
    logits = jnp.einsum('bhtd,bhsd->bhts', qh, kh) / (dph ** 0.5)
    w = jax.nn.softmax(logits.astype(jnp.float32), axis=-1)
    a = jnp.einsum('bhts,bhsd->bhtd', w, vh)                         # (bs, H, 1, dph)
    return a[:, :, 0, :].reshape(bs, E)


if __name__ == "__main__":
    BATCH, SEQ, EMBED, HEADS = 16, 8, 32, 4

    key = jax.random.PRNGKey(0)
    k_x, k_pos, k_wq, k_wk, k_wv, k_bq, k_bk, k_bv = jax.random.split(key, 8)

    x = jax.random.normal(k_x, (BATCH, SEQ, EMBED), dtype=jnp.float32)

    # Deterministic synthetic parameters (shapes from the module's __init__).
    params = {
        "positional_embedding": jax.random.normal(k_pos, (1, EMBED), jnp.float32)
                                / (EMBED ** 0.5),
        "wq": jax.random.normal(k_wq, (EMBED, EMBED), jnp.float32) * 0.05,  # (out, in)
        "wk": jax.random.normal(k_wk, (EMBED, EMBED), jnp.float32) * 0.05,
        "wv": jax.random.normal(k_wv, (EMBED, EMBED), jnp.float32) * 0.05,
        "bq": jax.random.normal(k_bq, (EMBED,), jnp.float32) * 0.05,
        "bk": jax.random.normal(k_bk, (EMBED,), jnp.float32) * 0.05,
        "bv": jax.random.normal(k_bv, (EMBED,), jnp.float32) * 0.05,
    }

    ref = attention_pooling_ref(x, params, HEADS)

    # f32-on-MXU path: tight correctness check.
    prep_f32 = prepare_attention_pooling_params(params, HEADS, jnp.float32)
    out_f32 = jax.block_until_ready(attention_pooling(x, prep_f32))
    assert out_f32.shape == (BATCH, EMBED)
    assert jnp.allclose(out_f32, ref, atol=1e-4, rtol=1e-4), (
        f"f32 max abs err {jnp.max(jnp.abs(out_f32 - ref))}")

    # bf16-weights path (native bf16 MXU for all matmuls, f32 accum & softmax).
    prep_bf16 = prepare_attention_pooling_params(params, HEADS, jnp.bfloat16)
    out_bf16 = jax.block_until_ready(attention_pooling(x, prep_bf16))
    assert jnp.allclose(out_bf16, ref, atol=3e-2, rtol=3e-2), (
        f"bf16 max abs err {jnp.max(jnp.abs(out_bf16 - ref))}")

    print("KERNEL_OK")
</pallas_src>

<mosaic_0001>
module attributes {stable_mosaic.version = 11 : i64} {
  func.func @_attn_pool_kernel(%arg0: i32, %arg1: memref<8x8x32xf32, #tpu.memory_space<vmem>>, %arg2: memref<1x32xf32, #tpu.memory_space<vmem>>, %arg3: memref<32x32xf32, #tpu.memory_space<vmem>>, %arg4: memref<32x32xf32, #tpu.memory_space<vmem>>, %arg5: memref<32x32xf32, #tpu.memory_space<vmem>>, %arg6: memref<1x32xf32, #tpu.memory_space<vmem>>, %arg7: memref<1x32xf32, #tpu.memory_space<vmem>>, %arg8: memref<1x32xf32, #tpu.memory_space<vmem>>, %arg9: memref<32x4xf32, #tpu.memory_space<vmem>>, %arg10: memref<4x32xf32, #tpu.memory_space<vmem>>, %arg11: memref<8x32xf32, #tpu.memory_space<vmem>>) attributes {dimension_semantics = [#tpu.dimension_semantics<parallel>], iteration_bounds = array<i64: 2>, scalar_prefetch = 0 : i64, scratch_operands = 0 : i64, tpu.core_type = #tpu.core_type<tc>, window_params = [{transform_indices = @transform_0, window_bounds = array<i64: 8, 8, 32>}, {pipeline_mode = #tpu.pipeline_mode<synchronous>, transform_indices = @transform_1, window_bounds = array<i64: 1, 32>}, {pipeline_mode = #tpu.pipeline_mode<synchronous>, transform_indices = @transform_2, window_bounds = array<i64: 32, 32>}, {pipeline_mode = #tpu.pipeline_mode<synchronous>, transform_indices = @transform_3, window_bounds = array<i64: 32, 32>}, {pipeline_mode = #tpu.pipeline_mode<synchronous>, transform_indices = @transform_4, window_bounds = array<i64: 32, 32>}, {pipeline_mode = #tpu.pipeline_mode<synchronous>, transform_indices = @transform_5, window_bounds = array<i64: 1, 32>}, {pipeline_mode = #tpu.pipeline_mode<synchronous>, transform_indices = @transform_6, window_bounds = array<i64: 1, 32>}, {pipeline_mode = #tpu.pipeline_mode<synchronous>, transform_indices = @transform_7, window_bounds = array<i64: 1, 32>}, {pipeline_mode = #tpu.pipeline_mode<synchronous>, transform_indices = @transform_8, window_bounds = array<i64: 32, 4>}, {pipeline_mode = #tpu.pipeline_mode<synchronous>, transform_indices = @transform_9, window_bounds = array<i64: 4, 32>}, {transform_indices = @transform_10, window_bounds = array<i64: 8, 32>}]} {
    %c0 = arith.constant 0 : index
    %c0_0 = arith.constant 0 : index
    %c0_1 = arith.constant 0 : index
    %0 = vector.load %arg1[%c0, %c0_0, %c0_1] : memref<8x8x32xf32, #tpu.memory_space<vmem>>, vector<8x8x32xf32>
    %cst = arith.constant dense<0.000000e+00> : vector<8x32xf32>
    %1 = vector.multi_reduction <add>, %0, %cst [1] : vector<8x8x32xf32> to vector<8x32xf32>
    %cst_2 = arith.constant 1.250000e-01 : f32
    %2 = vector.broadcast %cst_2 : f32 to vector<8x32xf32>
    %3 = arith.mulf %1, %2 : vector<8x32xf32>
    %c0_3 = arith.constant 0 : index
    %c0_4 = arith.constant 0 : index
    %4 = vector.load %arg2[%c0_3, %c0_4] : memref<1x32xf32, #tpu.memory_space<vmem>>, vector<1x32xf32>
    %5 = vector.broadcast %4 : vector<1x32xf32> to vector<8x32xf32>
    %6 = arith.addf %3, %5 : vector<8x32xf32>
    %7 = vector.shape_cast %0 : vector<8x8x32xf32> to vector<64x32xf32>
    %8 = tpu.concatenate %6, %7 in 0 : vector<8x32xf32>, vector<64x32xf32> -> vector<72x32xf32>
    %c0_5 = arith.constant 0 : index
    %c0_6 = arith.constant 0 : index
    %9 = vector.load %arg3[%c0_5, %c0_6] : memref<32x32xf32, #tpu.memory_space<vmem>>, vector<32x32xf32>
    %c0_7 = arith.constant 0 : index
    %c0_8 = arith.constant 0 : index
    %10 = vector.load %arg4[%c0_7, %c0_8] : memref<32x32xf32, #tpu.memory_space<vmem>>, vector<32x32xf32>
    %c0_9 = arith.constant 0 : index
    %c0_10 = arith.constant 0 : index
    %11 = vector.load %arg5[%c0_9, %c0_10] : memref<32x32xf32, #tpu.memory_space<vmem>>, vector<32x32xf32>
    %c0_11 = arith.constant 0 : index
    %c0_12 = arith.constant 0 : index
    %12 = vector.load %arg6[%c0_11, %c0_12] : memref<1x32xf32, #tpu.memory_space<vmem>>, vector<1x32xf32>
    %c0_13 = arith.constant 0 : index
    %c0_14 = arith.constant 0 : index
    %13 = vector.load %arg7[%c0_13, %c0_14] : memref<1x32xf32, #tpu.memory_space<vmem>>, vector<1x32xf32>
    %c0_15 = arith.constant 0 : index
    %c0_16 = arith.constant 0 : index
    %14 = vector.load %arg8[%c0_15, %c0_16] : memref<1x32xf32, #tpu.memory_space<vmem>>, vector<1x32xf32>
    %cst_17 = arith.constant dense<0.000000e+00> : vector<8x32xf32>
    %15 = tpu.matmul %6, %9, %cst_17 {dimension_numbers = #tpu.dot_dimension_numbers<[1], [0], [0], [1], [0, 0, 1, 1], [], []>} : vector<8x32xf32>, vector<32x32xf32>, vector<8x32xf32> -> vector<8x32xf32>
    %16 = vector.broadcast %12 : vector<1x32xf32> to vector<8x32xf32>
    %17 = arith.addf %15, %16 : vector<8x32xf32>
    %cst_18 = arith.constant dense<0.000000e+00> : vector<72x32xf32>
    %18 = tpu.matmul %8, %10, %cst_18 {dimension_numbers = #tpu.dot_dimension_numbers<[1], [0], [0], [1], [0, 0, 1, 1], [], []>} : vector<72x32xf32>, vector<32x32xf32>, vector<72x32xf32> -> vector<72x32xf32>
    %19 = vector.broadcast %13 : vector<1x32xf32> to vector<72x32xf32>
    %20 = arith.addf %18, %19 : vector<72x32xf32>
    %cst_19 = arith.constant dense<0.000000e+00> : vector<72x32xf32>
    %21 = tpu.matmul %8, %11, %cst_19 {dimension_numbers = #tpu.dot_dimension_numbers<[1], [0], [0], [1], [0, 0, 1, 1], [], []>} : vector<72x32xf32>, vector<32x32xf32>, vector<72x32xf32> -> vector<72x32xf32>
    %22 = vector.broadcast %14 : vector<1x32xf32> to vector<72x32xf32>
    %23 = arith.addf %21, %22 : vector<72x32xf32>
    %24 = vector.extract_strided_slice %20 {offsets = [0, 0], sizes = [8, 32], strides = [1, 1]} : vector<72x32xf32> to vector<8x32xf32>
    %25 = vector.extract_strided_slice %23 {offsets = [0, 0], sizes = [8, 32], strides = [1, 1]} : vector<72x32xf32> to vector<8x32xf32>
    %26 = vector.extract_strided_slice %20 {offsets = [8, 0], sizes = [64, 32], strides = [1, 1]} : vector<72x32xf32> to vector<64x32xf32>
    %27 = vector.shape_cast %26 : vector<64x32xf32> to vector<8x8x32xf32>
    %28 = vector.extract_strided_slice %23 {offsets = [8, 0], sizes = [64, 32], strides = [1, 1]} : vector<72x32xf32> to vector<64x32xf32>
    %29 = vector.shape_cast %28 : vector<64x32xf32> to vector<8x8x32xf32>
    %c0_20 = arith.constant 0 : index
    %c0_21 = arith.constant 0 : index
    %30 = vector.load %arg9[%c0_20, %c0_21] : memref<32x4xf32, #tpu.memory_space<vmem>>, vector<32x4xf32>
    %c0_22 = arith.constant 0 : index
    %c0_23 = arith.constant 0 : index
    %31 = vector.load %arg10[%c0_22, %c0_23] : memref<4x32xf32, #tpu.memory_space<vmem>>, vector<4x32xf32>
    %32 = vector.shape_cast %17 : vector<8x32xf32> to vector<8x1x32xf32>
    %33 = vector.broadcast %32 : vector<8x1x32xf32> to vector<8x8x32xf32>
    %34 = arith.mulf %27, %33 : vector<8x8x32xf32>
    %35 = vector.shape_cast %34 : vector<8x8x32xf32> to vector<64x32xf32>
    %cst_24 = arith.constant dense<0.000000e+00> : vector<64x4xf32>
    %36 = tpu.matmul %35, %30, %cst_24 {dimension_numbers = #tpu.dot_dimension_numbers<[1], [0], [0], [1], [0, 0, 1, 1], [], []>} : vector<64x32xf32>, vector<32x4xf32>, vector<64x4xf32> -> vector<64x4xf32>
    %37 = vector.shape_cast %36 : vector<64x4xf32> to vector<8x8x4xf32>
    %38 = arith.mulf %24, %17 : vector<8x32xf32>
    %cst_25 = arith.constant dense<0.000000e+00> : vector<8x4xf32>
    %39 = tpu.matmul %38, %30, %cst_25 {dimension_numbers = #tpu.dot_dimension_numbers<[1], [0], [0], [1], [0, 0, 1, 1], [], []>} : vector<8x32xf32>, vector<32x4xf32>, vector<8x4xf32> -> vector<8x4xf32>
    %cst_26 = arith.constant dense<0xFF800000> : vector<8x4xf32>
    %40 = vector.multi_reduction <maximumf>, %37, %cst_26 [1] : vector<8x8x4xf32> to vector<8x4xf32>
    %41 = arith.maximumf %39, %40 : vector<8x4xf32>
    %42 = arith.subf %39, %41 : vector<8x4xf32>
    %43 = math.exp %42 : vector<8x4xf32>
    %44 = vector.shape_cast %41 : vector<8x4xf32> to vector<8x1x4xf32>
    %45 = vector.broadcast %44 : vector<8x1x4xf32> to vector<8x8x4xf32>
    %46 = arith.subf %37, %45 : vector<8x8x4xf32>
    %47 = math.exp %46 : vector<8x8x4xf32>
    %cst_27 = arith.constant dense<0.000000e+00> : vector<8x4xf32>
    %48 = vector.multi_reduction <add>, %47, %cst_27 [1] : vector<8x8x4xf32> to vector<8x4xf32>
    %49 = arith.addf %43, %48 : vector<8x4xf32>
    %cst_28 = arith.constant dense<0.000000e+00> : vector<8x32xf32>
    %50 = tpu.matmul %43, %31, %cst_28 {dimension_numbers = #tpu.dot_dimension_numbers<[1], [0], [0], [1], [0, 0, 1, 1], [], []>} : vector<8x4xf32>, vector<4x32xf32>, vector<8x32xf32> -> vector<8x32xf32>
    %51 = vector.shape_cast %47 : vector<8x8x4xf32> to vector<64x4xf32>
    %cst_29 = arith.constant dense<0.000000e+00> : vector<64x32xf32>
    %52 = tpu.matmul %51, %31, %cst_29 {dimension_numbers = #tpu.dot_dimension_numbers<[1], [0], [0], [1], [0, 0, 1, 1], [], []>} : vector<64x4xf32>, vector<4x32xf32>, vector<64x32xf32> -> vector<64x32xf32>
    %53 = vector.shape_cast %52 : vector<64x32xf32> to vector<8x8x32xf32>
    %54 = tpu.reciprocal %49 : vector<8x4xf32> -> vector<8x4xf32>
    %cst_30 = arith.constant dense<0.000000e+00> : vector<8x32xf32>
    %55 = tpu.matmul %54, %31, %cst_30 {dimension_numbers = #tpu.dot_dimension_numbers<[1], [0], [0], [1], [0, 0, 1, 1], [], []>} : vector<8x4xf32>, vector<4x32xf32>, vector<8x32xf32> -> vector<8x32xf32>
    %56 = arith.mulf %50, %25 : vector<8x32xf32>
    %57 = arith.mulf %53, %29 : vector<8x8x32xf32>
    %cst_31 = arith.constant dense<0.000000e+00> : vector<8x32xf32>
    %58 = vector.multi_reduction <add>, %57, %cst_31 [1] : vector<8x8x32xf32> to vector<8x32xf32>
    %59 = arith.addf %56, %58 : vector<8x32xf32>
    %60 = arith.mulf %59, %55 : vector<8x32xf32>
    %c0_32 = arith.constant 0 : index
    %c0_33 = arith.constant 0 : index
    %61 = vector.load %arg11[%c0_32, %c0_33] : memref<8x32xf32, #tpu.memory_space<vmem>>, vector<8x32xf32>
    tpu.vector_store %arg11[%c0_32, %c0_33], %60 {strides = array<i32>} : memref<8x32xf32, #tpu.memory_space<vmem>>, vector<8x32xf32>,
    return
  }
  func.func @transform_0(%arg0: i32) -> (i32, i32, i32) {
    %c0_i32 = arith.constant 0 : i32
    %c0_i32_0 = arith.constant 0 : i32
    %c0_i32_1 = arith.constant 0 : i32
    return %arg0, %c0_i32, %c0_i32_0 : i32, i32, i32
  }
  func.func @transform_1(%arg0: i32) -> (i32, i32) {
    %c0_i32 = arith.constant 0 : i32
    %c0_i32_0 = arith.constant 0 : i32
    %c0_i32_1 = arith.constant 0 : i32
    return %c0_i32, %c0_i32_0 : i32, i32
  }
  func.func @transform_2(%arg0: i32) -> (i32, i32) {
    %c0_i32 = arith.constant 0 : i32
    %c0_i32_0 = arith.constant 0 : i32
    %c0_i32_1 = arith.constant 0 : i32
    return %c0_i32, %c0_i32_0 : i32, i32
  }
  func.func @transform_3(%arg0: i32) -> (i32, i32) {
    %c0_i32 = arith.constant 0 : i32
    %c0_i32_0 = arith.constant 0 : i32
    %c0_i32_1 = arith.constant 0 : i32
    return %c0_i32, %c0_i32_0 : i32, i32
  }
  func.func @transform_4(%arg0: i32) -> (i32, i32) {
    %c0_i32 = arith.constant 0 : i32
    %c0_i32_0 = arith.constant 0 : i32
    %c0_i32_1 = arith.constant 0 : i32
    return %c0_i32, %c0_i32_0 : i32, i32
  }
  func.func @transform_5(%arg0: i32) -> (i32, i32) {
    %c0_i32 = arith.constant 0 : i32
    %c0_i32_0 = arith.constant 0 : i32
    %c0_i32_1 = arith.constant 0 : i32
    return %c0_i32, %c0_i32_0 : i32, i32
  }
  func.func @transform_6(%arg0: i32) -> (i32, i32) {
    %c0_i32 = arith.constant 0 : i32
    %c0_i32_0 = arith.constant 0 : i32
    %c0_i32_1 = arith.constant 0 : i32
    return %c0_i32, %c0_i32_0 : i32, i32
  }
  func.func @transform_7(%arg0: i32) -> (i32, i32) {
    %c0_i32 = arith.constant 0 : i32
    %c0_i32_0 = arith.constant 0 : i32
    %c0_i32_1 = arith.constant 0 : i32
    return %c0_i32, %c0_i32_0 : i32, i32
  }
  func.func @transform_8(%arg0: i32) -> (i32, i32) {
    %c0_i32 = arith.constant 0 : i32
    %c0_i32_0 = arith.constant 0 : i32
    %c0_i32_1 = arith.constant 0 : i32
    return %c0_i32, %c0_i32_0 : i32, i32
  }
  func.func @transform_9(%arg0: i32) -> (i32, i32) {
    %c0_i32 = arith.constant 0 : i32
    %c0_i32_0 = arith.constant 0 : i32
    %c0_i32_1 = arith.constant 0 : i32
    return %c0_i32, %c0_i32_0 : i32, i32
  }
  func.func @transform_10(%arg0: i32) -> (i32, i32) {
    %c0_i32 = arith.constant 0 : i32
    %c0_i32_0 = arith.constant 0 : i32
    return %arg0, %c0_i32 : i32, i32
  }
}

</mosaic_0001>

<bundles_post_ra>
// kernel: tpu_custom_call.1
= control target key start
LH: loop header
LB: loop body
LE: loop exit
PB: predicated region body
PF: predicated region fallthrough
CT: control target
= control target key end

     0   :  { %s3041_s0 = inlined_call_operand.hbm [shape: f32[16,8,32], index: 0, kind: input, shape index: {}]   ;;  %s3042_s1 = inlined_call_operand.vmem [shape: f32[1,32], index: 1, kind: input, shape index: {}]   ;;  %s3043_s2 = inlined_call_operand.vmem [shape: f32[32,32], index: 2, kind: input, shape index: {}]   ;;  %s3044_s3 = inlined_call_operand.hbm [shape: f32[32,32], index: 3, kind: input, shape index: {}]   ;;  %s3045_s4 = inlined_call_operand.hbm [shape: f32[32,32], index: 4, kind: input, shape index: {}]   ;;  %s3046_s5 = inlined_call_operand.vmem [shape: f32[1,32], index: 5, kind: input, shape index: {}]   ;;  %s3047_s6 = inlined_call_operand.vmem [shape: f32[1,32], index: 6, kind: input, shape index: {}]   ;;  %s3048_s7 = inlined_call_operand.vmem [shape: f32[1,32], index: 7, kind: input, shape index: {}]   ;;  %s3049_s8 = inlined_call_operand.vmem [shape: f32[32,4], index: 8, kind: input, shape index: {}]   ;;  %s3050_s9 = inlined_call_operand.vmem [shape: f32[4,32], index: 9, kind: input, shape index: {}]   ;;  %s3051_s10 = inlined_call_operand.hbm [shape: f32[16,32], index: 10, kind: output, shape index: {}]  }
   0x1   :  { %3059 = sst [smem:[#allocation14_spill]] %s3044_s3 }
   0x2   :  { %3060 = sst [smem:[#allocation15_spill]] %s3045_s4 }
   0x3   :  { %15 = vsyncpa [#allocation3], 0 }
   0x4   :  { %17 = vsyncpa [#allocation3 + $0x1], 0 }
   0x5   :  { %18 = vsyncpa [#allocation6], 0 }
   0x6   :  { %19 = vsyncpa [#allocation4], 0 }
   0x7   :  { %21 = vsyncpa [#allocation4 + $0x1], 0  ;;  %s2477_s13 = smov 0   ;;  %s2479_s14 = smov 0  }
   0x8   :  { %s2481_s15 = smov 0   ;;  %s2483_s16 = smov 0  }
   0x9 LB: > { %3061 = sst [smem:[#allocation12_spill]] %s2407_s15  ;;  %s2498_s17 = sadd.s32 4294967295, %s2411_s16   ;;  %s2411_s16 = sphi %s2483_s16, %s3084_s16   ;;  %s2407_s15 = sphi %s2481_s15, %s3081_s15   ;;  %s2403_s14 = sphi %s2479_s14, %s3083_s14   ;;  %s2399_s13 = sphi %s2477_s13, %s3082_s13  }
   0xa   : > { %s1911_s18 = sadd.s32 4294967294, %s2411_s16   ;;  %p47_p0 = scmp.ne.s32.totalorder %s2403_s14, %s2399_s13 }
   0xb   : > { %p3054_p1 = scmp.eq.s32.totalorder %s2498_s17, 0  ;;  %p260_p2 = scmp.eq.s32.totalorder %s2498_s17, 1 }
   0xc   : > { %p266_p3 = scmp.eq.s32.totalorder %s1911_s18, 1  ;;  %p1912_p5 = scmp.ge.s32.totalorder %s2411_s16, 1 }
   0xd   : > { %p2507_p4 = por %p3054_p1, %p47_p0  ;;  %p273_p7 = scmp.lt.s32.totalorder %s2411_s16, 3 }
   0xe   : > { %p2512_p6 = por %p266_p3, %p47_p0  ;;  %s2413_s22 = smov [#allocation5]  }
   0xf   : > { %s3062_s19 = scalar_select %p2507_p4, 1, 0 }
  0x10   : > { %s3063_s20 = scalar_select %p2512_p6, 1, 0 }
  0x11   : > { %p2517_p8 = pnand %p1912_p5, %p273_p7  ;;  %s291_s23 = sshll.u32 %s2413_s22, 4  ;;  %s292_s23 = int_to_ptr.vmem [resolvable:$true] %s291_s23 }
  0x12   : > { %s2414_s25 = smov [#allocation7]   ;;  %s2274_s27 = scalar_lea.vmem %s292_s23, 512 }
  0x13   : > { %s3064_s21 = scalar_select %p2517_p8, 1, 0 }
  0x14   : > { %p2183_p9 = pneg %p2517_p8  ;;  %s304_s26 = sshll.u32 %s2414_s25, 4  ;;  %s305_s26 = int_to_ptr.vmem [resolvable:$true] %s304_s26 }
  0x15   : > { %p2275_p13 = scmp.ne.s32.totalorder %s292_s23, %s2274_s27  ;;  %p2282_p5 = scmp.lt.s32.totalorder %s292_s23, %s292_s23 }
  0x16   : > { %p2526_p11 = pnand %p2183_p9, %p3054_p1  ;;  %p2283_p7 = scmp.lt.s32.totalorder %s2274_s27, %s2274_s27 }
  0x18   : > { %p2265_p12 = pneg %p2526_p11  ;;  %p2284_p10 = por %p2283_p7, %p2282_p5 }
  0x1a   : > { %p2277_p0 = pnand %p2275_p13, %p2265_p12 }
  0x1c   : > { %p2278_p3 = pneg %p2277_p0 }
  0x1e   : > { %p2285_p9 = pnand %p2284_p10, %p2278_p3 }
  0x20   : > { %2288 = shalt.err (!%p2285_p9)
}
  0x21   : > { %s3052_s28 = smov 128   ;;  %s3053_s29 = smov 8  }
  0x22   : > { %s3066_s3 = sld [smem:[#allocation14_spill]]  ;;  %s2300_s12 = scalar_lea.vmem %s305_s26, 512 }
  0x23   : > { %p2301_p13 = scmp.ne.s32.totalorder %s305_s26, %s2300_s12  ;;  %p2308_p10 = scmp.lt.s32.totalorder %s305_s26, %s305_s26 }
  0x24   : > { %p2309_p3 = scmp.lt.s32.totalorder %s2300_s12, %s2300_s12 }
  0x25   : > { %p2303_p0 = pnand %p2301_p13, %p2265_p12 }
  0x26   : > { %p2310_p7 = por %p2309_p3, %p2308_p10 }
  0x27   : > { %p2304_p5 = pneg %p2303_p0 }
  0x28   : > { %2186 = dma.hbm_to_vmem [thread:$0]  (!%p2526_p11), %s3066_s3, 512, %s292_s23, [#allocation6], %s3052_s28, %s3052_s28, %s3053_s29  }
  0x29   : > { %p2311_p9 = pnand %p2310_p7, %p2304_p5 }
  0x2b   : > { %2314 = shalt.err (!%p2311_p9)
}
  0x2c   : > { %s3067_s4 = sld [smem:[#allocation15_spill]]  ;;  %s2555_s23 = sadd.s32 1, %s2411_s16  }
  0x2d   : > { %s34_s24 = sadd.s32 1, %s2407_s15  ;;  %s31_s25 = ssub.s32 %s2411_s16, %s2555_s23 }
  0x2e   : > { %p41_p12 = scmp.ne.s32.totalorder %s2407_s15, %s2403_s14  ;;  %p32_p13 = scmp.eq.s32.totalorder %s31_s25, 0 }
  0x2f   : > { %p42_p0 = scmp.eq.s32.totalorder %s2411_s16, 0  ;;  %p2200_p10 = scmp.lt.s32.totalorder %s2411_s16, 2 }
  0x30   : > { %p2565_p5 = por %p260_p2, %p41_p12  ;;  %s333_s11 = sand.u32 1, %s2407_s15  }
  0x31   : > { %s2571_s30 = scalar_select %p32_p13, %s2407_s15, %s34_s24  }
  0x32   : > { %2189 = dma.hbm_to_vmem [thread:$0]  (!%p2526_p11), %s3067_s4, 512, %s305_s26, [#allocation6], %s3052_s28, %s3052_s28, %s3053_s29  }
  0x33   : > { %s3068_s27 = scalar_select %p2565_p5, 1, 0 }
  0x34   : > { %3069 = sst [smem:[#allocation13_spill]] %s2571_s30  ;;  %p43_p3 = por %p42_p0, %p41_p12 }
  0x35   : > { %s1916_s12 = sshll.u32 %s333_s11, 6  ;;  %s1973_s26 = sshll.u32 %s2411_s16, 10 }
  0x36   : > { %s2578_s28 = scalar_lea.hbm %s3041_s0, %s1973_s26  ;;  %s337_s25 = scalar_lea.vmem [#allocation2], %s1916_s12 }
  0x37   : > { %s344_s29 = sshll.u32 %s337_s25, 4  ;;  %p2582_p2 = pnand %p2200_p10, %p43_p3  ;;  %s2580_s29 = int_to_ptr.vmem [resolvable:$true] %s344_s29 }
  0x38   : > { %s2586_s24 = scalar_lea.sflag [#allocation3], %s333_s11  ;;  %s2315_s4 = scalar_lea.hbm %s2578_s28, 1024 }
  0x39   : > { %p2316_p11 = scmp.ne.s32.totalorder %s2578_s28, %s2315_s4  ;;  %p2317_p7 = pneg %p2582_p2 }
  0x3a   : > { %s2320_s12 = scalar_lea.hbm %s3041_s0, 2048  ;;  %p2321_p13 = scmp.lt.s32.totalorder %s2578_s28, %s3041_s0 }
  0x3b   : > { %p2318_p9 = pnand %p2317_p7, %p2316_p11  ;;  %p2322_p0 = scmp.lt.s32.totalorder %s2320_s12, %s2315_s4 }
  0x3d   : > { %p2319_p12 = pneg %p2318_p9  ;;  %p2323_p10 = por %p2322_p0, %p2321_p13 }
  0x3f   : > { %p2324_p3 = pnand %p2323_p10, %p2319_p12 }
  0x41   : > { %2327 = shalt.err (!%p2324_p3)
}
  0x42   : > { %s2328_s11 = scalar_lea.vmem %s2580_s29, 1024  ;;  %s2417_s30 = smov [#allocation2]  }
  0x43   : > { %p2329_p1 = scmp.ne.s32.totalorder %s2580_s29, %s2328_s11  ;;  %s2333_s15 = sshll.u32 %s2417_s30, 4  ;;  %s2334_s15 = int_to_ptr.vmem [resolvable:$false] %s2333_s15 }
  0x44   : > { %s2335_s26 = scalar_lea.vmem %s2334_s15, 2048  ;;  %p2336_p9 = scmp.lt.s32.totalorder %s2580_s29, %s2334_s15 }
  0x45   : > { %p2331_p6 = pnand %p2329_p1, %p2317_p7  ;;  %p2337_p5 = scmp.lt.s32.totalorder %s2335_s26, %s2328_s11 }
  0x47   : > { %p2332_p11 = pneg %p2331_p6  ;;  %p2338_p4 = por %p2337_p5, %p2336_p9 }
  0x49   : > { %p2339_p8 = pnand %p2338_p4, %p2332_p11 }
  0x4b   : > { %2342 = shalt.err (!%p2339_p8)
}
  0x4c   : > { %s3071_s4 = smov 8   ;;  %s3072_s18 = smov 128  }
  0x4d   : > { %2193 = dma.hbm_to_vmem [thread:$0]  (!%p2582_p2), %s2578_s28, 1024, %s2580_s29, %s2586_s24, %s3072_s18, %s3072_s18, %s3071_s4  }
  0x4e   : > { %p3073_p1 = scmp.ne.s32.totalorder %s3064_s21, 0 }
  0x4f   : > { %s2613_s30 = sand.u32 (!%p3073_p1), 1, %s2403_s14   ;;  %p3074_p4 = scmp.ne.s32.totalorder (!%p3073_p1), %s3062_s19, 0 }
  0x50   : > { %356 = sbr.rel (%p3073_p1) target bundleno = 839 (0x347), region = 60  ;;  %s1920_s15 = sshll.u32 (!%p3073_p1), %s2613_s30, 6 }
  0x51   : > { %s359_s12 = scalar_lea.sflag (!%p3073_p1), [#allocation3], %s2613_s30  ;;  %s362_s22 = scalar_lea.vmem (!%p3073_p1), [#allocation2], %s1920_s15 }
  0x55   : > { %2386 = dma.done.wait (%p3074_p4), %s359_s12, 1024  }
  0x56   : > { %2388 = vsyncadd (%p3074_p4), %s359_s12, 4294966272  ;;  %p3075_p6 = scmp.eq.s32.totalorder %s2498_s17, 0 }
  0x58   : > { %2390 = dma.done.wait (%p3075_p6), [#allocation6], 1024   ;;  %p3076_p8 = pmov %p3075_p6 }
  0x59   : > { %v2418_v0 = vmov 0.0   ;;  %vm2419_vm0 = vmmov 0   ;;  %vm416_vm1 = vcmask 261120   ;;  %v528_v1 = vld [vmem:[%s3043_s2 + $0x18] sm:$0xff]  ;;  %v527_v2 = vld [vmem:[%s3043_s2 + $0x10] sm:$0xff]  ;;  %v526_v3 = vld [vmem:[%s3043_s2 + $0x8] sm:$0xff] }
  0x5a   : > { %2392 = vsyncadd (%p3076_p8), [#allocation6], 4294966272  ;;  %2035 = vmatprep.subr.mxu1 %v2418_v0  ;;  %2043 = vmatprep.mubr.msk.f32.mxu1 %vm2419_vm0, %v2418_v0  ;;  %v2640_v4 = vld [vmem:[%s362_s22] sm:$0xff]  ;;  %v2642_v5 = vld [vmem:[%s362_s22 + $0x8] sm:$0xff]  ;;  %vm505_vm2 = vcmask 1041409   ;;  %vm508_vm3 = vcmask 1042434  }
  0x5b   : > { %2081 = vmatprep.subr.mxu0 %v2418_v0  ;;  %2089 = vmatprep.mubr.msk.f32.mxu0 %vm2419_vm0, %v2418_v0  ;;  %v2645_v6 = vld [vmem:[%s362_s22 + $0x10] sm:$0xff]  ;;  %v2647_v7 = vld [vmem:[%s362_s22 + $0x18] sm:$0xff]  ;;  %v2649_v8 = vld [vmem:[%s362_s22 + $0x20] sm:$0xff]  ;;  %v417_v9 = vsel %vm416_vm1, %v2640_v4, 0.0  ;;  %v424_v10 = vsel %vm416_vm1, %v2642_v5, 0.0  ;;  %vm511_vm4 = vcmask 1043459  }
  0x5c   : > { %2036 = vmatpush3.msra.mxu1 %v528_v1  ;;  %v2655_v11 = vld [vmem:[%s362_s22 + $0x28] sm:$0xff]  ;;  %v2657_v12 = vld [vmem:[%s362_s22 + $0x30] sm:$0xff]  ;;  %v2659_v13 = vld [vmem:[%s362_s22 + $0x38] sm:$0xff]  ;;  %v418_v14 = vrot.slane %v417_v9, 4  ;;  %v425_v15 = vrot.slane %v424_v10, 4  ;;  %v431_v16 = vsel %vm416_vm1, %v2645_v6, 0.0 }
  0x5d   : > { %2037 = vmatprep.subr.mxu1 %v2418_v0  ;;  %v525_v17 = vld [vmem:[%s3043_s2] sm:$0xff]  ;;  %v432_v18 = vrot.slane %v431_v16, 4  ;;  %v438_v19 = vsel %vm416_vm1, %v2647_v7, 0.0  ;;  %v445_v20 = vsel %vm416_vm1, %v2649_v8, 0.0  ;;  %v452_v21 = vsel %vm416_vm1, %v2655_v11, 0.0  ;;  %v536_v30 = vld [vmem:[#allocation7 + $0x18] sm:$0xff] }
  0x5e   : > { %2038 = vmatpush3.msra.mxu1 %v527_v2  ;;  %v419_v22 = vadd.f32 %v418_v14, %v417_v9  ;;  %v426_v23 = vadd.f32 %v425_v15, %v424_v10  ;;  %v439_v24 = vrot.slane %v438_v19, 4  ;;  %v446_v25 = vrot.slane %v445_v20, 4  ;;  %v535_v31 = vld [vmem:[#allocation7 + $0x10] sm:$0xff]  ;;  %2082 = vmatpush3.msra.mxu0 %v536_v30  ;;  %v534_v40 = vld [vmem:[#allocation7 + $0x8] sm:$0xff]  ;;  %v533_v49 = vld [vmem:[#allocation7] sm:$0xff]  ;;  %s1923_s12 = sshll.u32 %s2613_s30, 3 }
  0x5f   : > { %2039 = vmatprep.subr.mxu1 %v2418_v0  ;;  %v433_v26 = vadd.f32 %v432_v18, %v431_v16  ;;  %v453_v27 = vrot.slane %v452_v21, 4  ;;  %v459_v28 = vsel %vm416_vm1, %v2657_v12, 0.0  ;;  %v466_v29 = vsel %vm416_vm1, %v2659_v13, 0.0  ;;  %2083 = vmatprep.subr.mxu0 %v2418_v0  ;;  %s1970_s22 = sshll.u32 %s2498_s17, 7  ;;  %s406_s3 = scalar_lea.vmem [#allocation8], %s1923_s12 }
  0x60   : > { %2040 = vmatpush3.msra.mxu1 %v526_v3  ;;  %v420_v32 = vrot.slane %v419_v22, 2  ;;  %v427_v33 = vrot.slane %v426_v23, 2  ;;  %v440_v34 = vadd.f32 %v439_v24, %v438_v19  ;;  %v447_v35 = vadd.f32 %v446_v25, %v445_v20  ;;  %2084 = vmatpush3.msra.mxu0 %v535_v31  ;;  %v1924_v3 = vld [vmem:[%s3042_s1] ss:$0 sm:$0xff]  ;;  %s1822_s19 = sshll.u32 %s406_s3, 4  ;;  %s3003_s29 = scalar_lea.hbm %s3051_s10, %s1970_s22  ;;  %s1823_s19 = int_to_ptr.vmem [resolvable:$true] %s1822_s19 }
  0x61   : > { %2041 = vmatprep.subr.mxu1 %v2418_v0  ;;  %v434_v36 = vrot.slane %v433_v26, 2  ;;  %v454_v37 = vadd.f32 %v453_v27, %v452_v21  ;;  %v460_v38 = vrot.slane %v459_v28, 4  ;;  %v467_v39 = vrot.slane %v466_v29, 4  ;;  %2085 = vmatprep.subr.mxu0 %v2418_v0  ;;  %s1809_s24 = scalar_lea.sflag [#allocation4], %s2613_s30  ;;  %s2343_s25 = scalar_lea.vmem %s1823_s19, 128 }
  0x62   : > { %2042 = vmatpush3.msra.mxu1 %v525_v17  ;;  %v421_v41 = vadd.f32 %v420_v32, %v419_v22  ;;  %v428_v42 = vadd.f32 %v427_v33, %v426_v23  ;;  %v441_v43 = vrot.slane %v440_v34, 2  ;;  %v448_v44 = vrot.slane %v447_v35, 2  ;;  %2086 = vmatpush3.msra.mxu0 %v534_v40  ;;  %p2344_p5 = scmp.ne.s32.totalorder %s1823_s19, %s2343_s25  ;;  %p3077_p2 = scmp.ne.s32.totalorder %s3068_s27, 0 }
  0x63   : > { %2046 = vmatprep.subr.mxu1 %v2418_v0  ;;  %v435_v45 = vadd.f32 %v434_v36, %v433_v26  ;;  %v455_v46 = vrot.slane %v454_v37, 2  ;;  %v461_v47 = vadd.f32 %v460_v38, %v459_v28  ;;  %v468_v48 = vadd.f32 %v467_v39, %v466_v29  ;;  %2087 = vmatprep.subr.mxu0 %v2418_v0  ;;  %s2421_s17 = smov [#allocation8]  }
  0x64   : > { %v422_v50 = vrot.slane %v421_v41, 1  ;;  %v429_v51 = vrot.slane %v428_v42, 1  ;;  %v442_v52 = vadd.f32 %v441_v43, %v440_v34  ;;  %v449_v53 = vadd.f32 %v448_v44, %v447_v35  ;;  %2088 = vmatpush3.msra.mxu0 %v533_v49  ;;  %p2345_p7 = pnand %p2344_p5, %p3077_p2  ;;  %s2347_s11 = sshll.u32 %s2421_s17, 4  ;;  %s2348_s11 = int_to_ptr.vmem [resolvable:$false] %s2347_s11 }
  0x65   : > { %v436_v54 = vrot.slane %v435_v45, 1  ;;  %v456_v55 = vadd.f32 %v455_v46, %v454_v37  ;;  %v462_v56 = vrot.slane %v461_v47, 2  ;;  %v469_v57 = vrot.slane %v468_v48, 2  ;;  %2136 = vmatprep.subr.mxu0 %v2418_v0  ;;  %s2349_s26 = scalar_lea.vmem %s2348_s11, 256  ;;  %p2350_p13 = scmp.lt.s32.totalorder %s1823_s19, %s2348_s11 }
  0x66   : > { %v423_v58 = vadd.f32 %v422_v50, %v421_v41  ;;  %v430_v59 = vadd.f32 %v429_v51, %v428_v42  ;;  %v443_v60 = vrot.slane %v442_v52, 1  ;;  %v450_v61 = vrot.slane %v449_v53, 1  ;;  %v531_v50 = vld [vmem:[#allocation5 + $0x10] sm:$0xff]  ;;  %v877_v51 = vld [vmem:[%s3049_s8 + $0x18] sm:$0xff]  ;;  %p2346_p12 = pneg %p2345_p7  ;;  %p2351_p0 = scmp.lt.s32.totalorder %s2349_s26, %s2343_s25 }
  0x67   : > { %v437_v62 = vadd.f32 %v436_v54, %v435_v45  ;;  %v457_v63 = vrot.slane %v456_v55, 1  ;;  %v463_v1 = vadd.f32 %v462_v56, %v461_v47  ;;  %v470_v2 = vadd.f32 %v469_v57, %v468_v48  ;;  %v532_v48 = vld [vmem:[#allocation5 + $0x18] sm:$0xff]  ;;  %v1925_v54 = vld [vmem:[%s3046_s5] ss:$0 sm:$0xff] }
  0x68   : > { %v444_v9 = vadd.f32 %v443_v60, %v442_v52  ;;  %v451_v10 = vadd.f32 %v450_v61, %v449_v53  ;;  %v473_v14 = vmul.f32 0.125, %v423_v58  ;;  %v474_v15 = vmul.f32 0.125, %v430_v59  ;;  %v530_v52 = vld [vmem:[#allocation5 + $0x8] sm:$0xff]  ;;  %v529_v53 = vld [vmem:[#allocation5] sm:$0xff]  ;;  %p2352_p10 = por %p2351_p0, %p2350_p13 }
  0x69   : > { %v458_v16 = vadd.f32 %v457_v63, %v456_v55  ;;  %v464_v17 = vrot.slane %v463_v1, 1  ;;  %v471_v18 = vrot.slane %v470_v2, 1  ;;  %v475_v19 = vmul.f32 0.125, %v437_v62  ;;  %v2797_v63 = vld [vmem:[%s3047_s6] ss:$0 sm:$0xff] }
  0x6a   : > { %v476_v20 = vmul.f32 0.125, %v444_v9  ;;  %v477_v21 = vmul.f32 0.125, %v451_v10  ;;  %v488_v22 = vadd.f32 %v1924_v3, %v473_v14  ;;  %v489_v23 = vadd.f32 %v1924_v3, %v474_v15  ;;  %p2353_p3 = pnand %p2352_p10, %p2346_p12 }
  0x6b   : > { %v465_v24 = vadd.f32 %v464_v17, %v463_v1  ;;  %v472_v25 = vadd.f32 %v471_v18, %v470_v2  ;;  %v478_v26 = vmul.f32 0.125, %v458_v16  ;;  %v490_v27 = vadd.f32 %v1924_v3, %v475_v19 }
  0x6c   : > { %v491_v28 = vadd.f32 %v1924_v3, %v476_v20  ;;  %v492_v29 = vadd.f32 %v1924_v3, %v477_v21  ;;  %v504_v30 = vrot.slane %v489_v23, 7  ;;  %vm514_vm5 = vcmask 1044484  }
  0x6d   : > { %v479_v31 = vmul.f32 0.125, %v465_v24  ;;  %v480_v32 = vmul.f32 0.125, %v472_v25  ;;  %v493_v33 = vadd.f32 %v1924_v3, %v478_v26  ;;  %v507_v34 = vrot.slane %v490_v27, 6 }
  0x6e   : > { %v506_v35 = vsel %vm505_vm2, %v504_v30, %v488_v22  ;;  %v510_v36 = vrot.slane %v491_v28, 5  ;;  %v513_v37 = vrot.slane %v492_v29, 4  ;;  %vm517_vm6 = vcmask 1045509  }
  0x6f   : > { %v494_v38 = vadd.f32 %v1924_v3, %v479_v31  ;;  %v495_v39 = vadd.f32 %v1924_v3, %v480_v32  ;;  %v509_v40 = vsel %vm508_vm3, %v507_v34, %v506_v35  ;;  %v516_v41 = vrot.slane %v493_v33, 3 }
  0x70   : > { %v512_v42 = vsel %vm511_vm4, %v510_v36, %v509_v40  ;;  %vm520_vm7 = vcmask 1046534   ;;  %vm523_vm8 = vcmask 1047559   ;;  %vm1447_vm9 = vcmask 1043456  }
  0x71   : > { %v515_v43 = vsel %vm514_vm5, %v513_v37, %v512_v42  ;;  %v519_v44 = vrot.slane %v494_v38, 2  ;;  %v522_v45 = vrot.slane %v495_v39, 1  ;;  %vm1180_vm10 = vcmask 31744  }
  0x72   : > { %v518_v46 = vsel %vm517_vm6, %v516_v41, %v515_v43 }
  0x73   : > { %v521_v47 = vsel %vm520_vm7, %v519_v44, %v518_v46 }
  0x74   : > { %v524_v49 = vsel %vm523_vm8, %v522_v45, %v521_v47 }
  0x75   : > { %2044 = vmatmul.mubr.msk.f32.vlgmr.msra.gmra.mxu1 %vm416_vm1, %v524_v49  ;;  %2090 = vmatmul.mubr.msk.f32.vlgmr.msra.gmra.mxu0 %vm416_vm1, %v524_v49 }
  0x76   : > { %2047 = vmatpush3.msra.mxu1 %v532_v48  ;;  %2054 = vmatprep.mubr.msk.f32.mxu1 %vm2419_vm0, %v2418_v0 }
  0x77   : > { %2048 = vmatprep.subr.mxu1 %v2418_v0  ;;  %2092 = vmatprep.mubr.msk.f32.mxu0 %vm2419_vm0, %v2418_v0 }
  0x78   : > { %2049 = vmatpush3.msra.mxu1 %v531_v50  ;;  %2137 = vmatpush3.msra.mxu0 %v877_v51 }
  0x79   : > { %2050 = vmatprep.subr.mxu1 %v2418_v0  ;;  %2093 = vmatmul.mubr.msk.f32.gmra.mxu0 %vm416_vm1, %v2640_v4 }
  0x7a   : > { %2051 = vmatpush3.msra.mxu1 %v530_v52  ;;  %2095 = vmatprep.mubr.msk.f32.mxu0 %vm2419_vm0, %v2418_v0 }
  0x7b   : > { %2052 = vmatprep.subr.mxu1 %v2418_v0  ;;  %2138 = vmatprep.subr.mxu0 %v2418_v0 }
  0x7c   : > { %2053 = vmatpush3.msra.mxu1 %v529_v53 }
  0x7d   : > { %2055 = vmatmul.mubr.msk.f32.vlgmr.msra.gmra.mxu1 %vm416_vm1, %v524_v49  ;;  %2096 = vmatmul.mubr.msk.f32.gmra.mxu0 %vm416_vm1, %v2642_v5 }
  0x7e   : > { %2057 = vmatprep.mubr.msk.f32.mxu1 %vm2419_vm0, %v2418_v0  ;;  %2098 = vmatprep.mubr.msk.f32.mxu0 %vm2419_vm0, %v2418_v0 }
  0x7f   : > { %2116 = vmatprep.subr.mxu1 %v877_v51 }
  0x80   : > { %2117 = vmatpush3.msra.mxu1 %v877_v51 }
  0x81   : > { %2058 = vmatmul.mubr.msk.f32.gmra.mxu1 %vm416_vm1, %v2640_v4  ;;  %2099 = vmatmul.mubr.msk.f32.gmra.mxu0 %vm416_vm1, %v2645_v6  ;;  %v876_v4 = vld [vmem:[%s3049_s8 + $0x10] sm:$0xff] }
  0x82   : > { %2060 = vmatprep.mubr.msk.f32.mxu1 %vm2419_vm0, %v2418_v0  ;;  %2101 = vmatprep.mubr.msk.f32.mxu0 %vm2419_vm0, %v2418_v0 }
  0x83   : > { %2118 = vmatprep.subr.mxu1 %v876_v4  ;;  %2139 = vmatpush3.msra.mxu0 %v876_v4 }
  0x84   : > { %2119 = vmatpush3.msra.mxu1 %v876_v4  ;;  %2140 = vmatprep.subr.mxu0 %v2418_v0 }
  0x85   : > { %2061 = vmatmul.mubr.msk.f32.gmra.mxu1 %vm416_vm1, %v2642_v5  ;;  %2102 = vmatmul.mubr.msk.f32.gmra.mxu0 %vm416_vm1, %v2647_v7  ;;  %v875_v5 = vld [vmem:[%s3049_s8 + $0x8] sm:$0xff] }
  0x86   : > { %2063 = vmatprep.mubr.msk.f32.mxu1 %vm2419_vm0, %v2418_v0  ;;  %2104 = vmatprep.mubr.msk.f32.mxu0 %vm2419_vm0, %v2418_v0 }
  0x87   : > { %2141 = vmatpush3.msra.mxu0 %v875_v5  ;;  %2120 = vmatprep.subr.mxu1 %v875_v5 }
  0x88   : > { %2142 = vmatprep.subr.mxu0 %v2418_v0  ;;  %2121 = vmatpush3.msra.mxu1 %v875_v5 }
  0x89   : > { %2064 = vmatmul.mubr.msk.f32.gmra.mxu1 %vm416_vm1, %v2645_v6  ;;  %2105 = vmatmul.mubr.msk.f32.gmra.mxu0 %vm416_vm1, %v2649_v8  ;;  %v874_v6 = vld [vmem:[%s3049_s8] sm:$0xff] }
  0x8a   : > { %2066 = vmatprep.mubr.msk.f32.mxu1 %vm2419_vm0, %v2418_v0  ;;  %2107 = vmatprep.mubr.msk.f32.mxu0 %vm2419_vm0, %v2418_v0 }
  0x8b   : > { %2143 = vmatpush3.msra.mxu0 %v874_v6  ;;  %2122 = vmatprep.subr.mxu1 %v874_v6 }
  0x8c   : > { %2123 = vmatpush3.msra.mxu1 %v874_v6  ;;  %2147 = vmatprep.subr.mxu0 %v2418_v0 }
  0x8d   : > { %2067 = vmatmul.mubr.msk.f32.gmra.mxu1 %vm416_vm1, %v2647_v7  ;;  %2108 = vmatmul.mubr.msk.f32.gmra.mxu0 %vm416_vm1, %v2655_v11  ;;  %v2420_v7 = vmov 1966171168  }
  0x8e   : > { %2069 = vmatprep.mubr.msk.f32.mxu1 %vm2419_vm0, %v2418_v0  ;;  %2110 = vmatprep.mubr.msk.f32.mxu0 %vm2419_vm0, %v2418_v0 }
  0x8f   : > { %2166 = vmatprep.subr.mxu1 %v2418_v0 }
  0x91   : > { %2070 = vmatmul.mubr.msk.f32.gmra.mxu1 %vm416_vm1, %v2649_v8  ;;  %2111 = vmatmul.mubr.msk.f32.gmra.mxu0 %vm416_vm1, %v2657_v12  ;;  %v882_v8 = vunpack.c.l.s4 %v2420_v7 }
  0x92   : > { %2072 = vmatprep.mubr.msk.f32.mxu1 %vm2419_vm0, %v2418_v0  ;;  %2113 = vmatprep.mubr.msk.f32.mxu0 %vm2419_vm0, %v2418_v0 }
  0x95   : > { %2073 = vmatmul.mubr.msk.f32.gmra.mxu1 %vm416_vm1, %v2655_v11  ;;  %2114 = vmatmul.mubr.msk.f32.gmra.mxu0 %vm416_vm1, %v2659_v13  ;;  %v884_v11 = vlaneseq }
  0x96   : > { %2075 = vmatprep.mubr.msk.f32.mxu1 %vm2419_vm0, %v2418_v0  ;;  %2144 = vmatprep.mubr.msk.f32.mxu0 %vm2419_vm0, %v2418_v0 }
  0x99   : > { %2076 = vmatmul.mubr.msk.f32.gmra.mxu1 %vm416_vm1, %v2657_v12  ;;  %v883_v12 = vunpack.c.0.s8 %v882_v8 }
  0x9a   : > { %2078 = vmatprep.mubr.msk.f32.mxu1 %vm2419_vm0, %v2418_v0 }
  0x9d   : > { %2079 = vmatmul.mubr.msk.f32.gmra.mxu1 %vm416_vm1, %v2659_v13  ;;  %v885_v13 = vshrl.u32 %v884_v11, 7 }
  0x9f   : > { %v2789_v58 = vsub.s32 %v883_v12, %v885_v13  ;;  %v2801_v10 = vsub.s32 0, %v885_v13 }
 0x135   : > { %v614_v55 = vpop.f32.mrf.mxu1  ;;  %v2787_v56 = vpop.f32.mrf.mxu0 }
 0x136   : > { %v615_v57 = vadd.f32 %v1925_v54, %v614_v55 }
 0x137   : > { %v2045_v59 = vpop.f32.mrf.mxu1  ;;  %v2091_v60 = vpop.f32.mrf.mxu0 }
 0x138   : > { %v887_v62 = vrot.slane %v615_v57, %v2789_v58  ;;  %v880_v29 = vcombine.high %v615_v57, %v615_v57 }
 0x139   : > { %v2791_v61 = vpop.f32.mrf.mxu0 }
 0x13a   : > { %v895_v9 = vcombine.high %v887_v62, %v887_v62  ;;  %v903_v15 = vrot.slane %v887_v62, %v2789_v58  ;;  %v894_v38 = vrot.slane %v880_v29, %v2789_v58 }
 0x13b   : > { %v2094_v1 = vpop.f32.mrf.mxu0 }
 0x13c   : > { %v932_v22 = vrot.slane %v903_v15, %v2801_v10  ;;  %v917_v23 = vrot.slane %v895_v9, %v2789_v58  ;;  %v925_v32 = vcombine.high %v903_v15, %v903_v15  ;;  %v910_v49 = vrot.slane %v894_v38, %v2789_v58 }
 0x13d   : > { %v714_v2 = vpop.f32.mrf.mxu1  ;;  %v2799_v3 = vpop.f32.mrf.mxu0  ;;  %v896_v50 = vcombine.high %v894_v38, %v894_v38 }
 0x13e   : > { %v715_v14 = vadd.f32 %v2797_v63, %v714_v2  ;;  %v936_v31 = vrot.slane %v917_v23, %v2801_v10  ;;  %v940_v40 = vrot.slane %v925_v32, %v2801_v10  ;;  %v927_v41 = vcombine.high %v917_v23, %v917_v23 }
 0x13f   : > { %v2056_v16 = vpop.f32.mrf.mxu1  ;;  %v2097_v17 = vpop.f32.mrf.mxu0  ;;  %v948_v7 = vrot.slane %v910_v49, %v2801_v10  ;;  %v924_v8 = vrot.slane %v896_v50, %v2789_v58  ;;  %v926_v60 = vcombine.high %v910_v49, %v910_v49 }
 0x140   : > { %v1106_v18 = vmul.f32 %v715_v14, %v615_v57  ;;  %v944_v48 = vrot.slane %v927_v41, %v2801_v10 }
 0x141   : > { %v719_v19 = vpop.f32.mrf.mxu1  ;;  %v2805_v20 = vpop.f32.mrf.mxu0  ;;  %v952_v59 = vrot.slane %v924_v8, %v2801_v10  ;;  %v956_v15 = vrot.slane %v926_v60, %v2801_v10  ;;  %v928_v16 = vcombine.high %v924_v8, %v924_v8 }
 0x142   : > { %v720_v21 = vadd.f32 %v2797_v63, %v719_v19  ;;  %2145 = vmatmul.mubr.msk.f32.vlgmr.msra.gmra.mxu0 %vm416_vm1, %v1106_v18 }
 0x143   : > { %v2059_v24 = vpop.f32.mrf.mxu1  ;;  %v2100_v25 = vpop.f32.mrf.mxu0  ;;  %2149 = vmatprep.mubr.msk.f32.mxu0 %vm2419_vm0, %v2418_v0 }
 0x144   : > { %v969_v26 = vmul.f32 %v932_v22, %v720_v21  ;;  %v960_v22 = vrot.slane %v928_v16, %v2801_v10  ;;  %v2853_v25 = vld [vmem:[%s3050_s9] sm:$0xf] }
 0x145   : > { %v724_v27 = vpop.f32.mrf.mxu1  ;;  %v2813_v28 = vpop.f32.mrf.mxu0  ;;  %2148 = vmatpush3.msk.msra.mxu0 %vm1447_vm9, %v2853_v25 }
 0x146   : > { %v725_v30 = vadd.f32 %v2797_v63, %v724_v27  ;;  %2124 = vmatprep.mubr.msk.f32.mxu1 %vm416_vm1, %v969_v26  ;;  %2152 = vmatprep.subr.msk.mxu0 %vm1447_vm9, %v2853_v25 }
 0x147   : > { %v2062_v33 = vpop.f32.mrf.mxu1  ;;  %v2103_v34 = vpop.f32.mrf.mxu0 }
 0x148   : > { %v970_v35 = vmul.f32 %v936_v31, %v725_v30 }
 0x149   : > { %v729_v36 = vpop.f32.mrf.mxu1  ;;  %v2818_v37 = vpop.f32.mrf.mxu0 }
 0x14a   : > { %v730_v39 = vadd.f32 %v2797_v63, %v729_v36  ;;  %2125 = vmatmul.mubr.msk.f32.vlgmr.msra.gmra.mxu1 %vm416_vm1, %v970_v35 }
 0x14b   : > { %v2065_v42 = vpop.f32.mrf.mxu1  ;;  %v2106_v43 = vpop.f32.mrf.mxu0  ;;  %2167 = vmatpush3.msk.msra.mxu1 %vm1447_vm9, %v2853_v25 }
 0x14c   : > { %v971_v44 = vmul.f32 %v940_v40, %v730_v39 }
 0x14d   : > { %v734_v45 = vpop.f32.mrf.mxu1  ;;  %v2824_v46 = vpop.f32.mrf.mxu0 }
 0x14e   : > { %v735_v47 = vadd.f32 %v2797_v63, %v734_v45  ;;  %2127 = vmatprep.mubr.msk.f32.mxu1 %vm416_vm1, %v971_v44 }
 0x14f   : > { %v2068_v51 = vpop.f32.mrf.mxu1  ;;  %v2109_v52 = vpop.f32.mrf.mxu0 }
 0x150   : > { %v972_v53 = vmul.f32 %v944_v48, %v735_v47 }
 0x151   : > { %v739_v4 = vpop.f32.mrf.mxu1  ;;  %v2830_v5 = vpop.f32.mrf.mxu0 }
 0x152   : > { %v740_v6 = vadd.f32 %v2797_v63, %v739_v4  ;;  %2128 = vmatmul.mubr.msk.f32.gmra.mxu1 %vm416_vm1, %v972_v53 }
 0x153   : > { %v2071_v11 = vpop.f32.mrf.mxu1  ;;  %v2112_v12 = vpop.f32.mrf.mxu0 }
 0x154   : > { %v973_v13 = vmul.f32 %v948_v7, %v740_v6 }
 0x155   : > { %v744_v54 = vpop.f32.mrf.mxu1  ;;  %v2836_v55 = vpop.f32.mrf.mxu0 }
 0x156   : > { %v745_v57 = vadd.f32 %v2797_v63, %v744_v54  ;;  %2130 = vmatprep.mubr.msk.f32.mxu1 %vm416_vm1, %v973_v13 }
 0x157   : > { %v2074_v62 = vpop.f32.mrf.mxu1  ;;  %v2115_v1 = vpop.f32.mrf.mxu0 }
 0x158   : > { %v974_v2 = vmul.f32 %v952_v59, %v745_v57 }
 0x159   : > { %v749_v9 = vpop.f32.mrf.mxu1 }
 0x15a   : > { %v750_v14 = vadd.f32 %v2797_v63, %v749_v9  ;;  %2131 = vmatmul.mubr.msk.f32.gmra.mxu1 %vm416_vm1, %v974_v2 }
 0x15b   : > { %v2077_v17 = vpop.f32.mrf.mxu1 }
 0x15c   : > { %v975_v18 = vmul.f32 %v956_v15, %v750_v14 }
 0x15d   : > { %v754_v19 = vpop.f32.mrf.mxu1 }
 0x15e   : > { %v755_v21 = vadd.f32 %v2797_v63, %v754_v19  ;;  %2133 = vmatprep.mubr.msk.f32.mxu1 %vm416_vm1, %v975_v18 }
 0x15f   : > { %v2080_v23 = vpop.f32.mrf.mxu1 }
 0x160   : > { %v976_v24 = vmul.f32 %v960_v22, %v755_v21 }
 0x162   : > { %2134 = vmatmul.mubr.msk.f32.gmra.mxu1 %vm416_vm1, %v976_v24 }
 0x163   : > { %2168 = vmatprep.mubr.msk.f32.mxu1 %vm2419_vm0, %v2418_v0 }
 0x202   : > { %v2861_v63 = vpop.f32.mrf.mxu0 }
 0x204   : > { %v2146_v26 = vpop.f32.mrf.mxu0 }
 0x20a   : > { %v2863_v27 = vpop.f32.mrf.mxu1 }
 0x20b   : > { %v1188_v30 = vsel %vm1180_vm10, %v2863_v27, -inf }
 0x20c   : > { %v2865_v0 = vpop.f32.mrf.mxu1  ;;  %v1189_v33 = vrot.slane %v1188_v30, 4 }
 0x20d   : > { %v1181_v29 = vsel %vm1180_vm10, %v2865_v0, -inf }
 0x20e   : > { %v1182_v31 = vrot.slane %v1181_v29, 4  ;;  %v1190_v40 = vmax.f32 %v1188_v30, %v1189_v33 }
 0x210   : > { %v1183_v36 = vmax.f32 %v1181_v29, %v1182_v31  ;;  %v1191_v47 = vrot.slane %v1190_v40, 2 }
 0x212   : > { %v2871_v32 = vpop.f32.mrf.mxu1  ;;  %v1184_v43 = vrot.slane %v1183_v36, 2  ;;  %v1192_v7 = vmax.f32 %v1190_v40, %v1191_v47 }
 0x213   : > { %v1202_v34 = vsel %vm1180_vm10, %v2871_v32, -inf }
 0x214   : > { %v2875_v35 = vpop.f32.mrf.mxu1  ;;  %v1203_v41 = vrot.slane %v1202_v34, 4  ;;  %v1185_v52 = vmax.f32 %v1183_v36, %v1184_v43  ;;  %v1193_v60 = vrot.slane %v1192_v7, 1 }
 0x215   : > { %v1195_v38 = vsel %vm1180_vm10, %v2875_v35, -inf }
 0x216   : > { %v1196_v39 = vrot.slane %v1195_v38, 4  ;;  %v1204_v48 = vmax.f32 %v1202_v34, %v1203_v41  ;;  %v1186_v13 = vrot.slane %v1185_v52, 1  ;;  %v1194_v23 = vmax.f32 %v1192_v7, %v1193_v60 }
 0x218   : > { %v1197_v42 = vmax.f32 %v1195_v38, %v1196_v39  ;;  %v1205_v8 = vrot.slane %v1204_v48, 2  ;;  %v1187_v16 = vmax.f32 %v1185_v52, %v1186_v13 }
 0x21a   : > { %v1198_v44 = vrot.slane %v1197_v42, 2  ;;  %v2879_v45 = vpop.f32.mrf.mxu1  ;;  %v1206_v62 = vmax.f32 %v1204_v48, %v1205_v8  ;;  %v1245_v31 = vsel %vm505_vm2, %v1194_v23, %v1187_v16 }
 0x21b   : > { %v1216_v49 = vsel %vm1180_vm10, %v2879_v45, -inf }
 0x21c   : > { %v1217_v50 = vrot.slane %v1216_v49, 4  ;;  %v2883_v51 = vpop.f32.mrf.mxu1  ;;  %v1199_v4 = vmax.f32 %v1197_v42, %v1198_v44  ;;  %v1207_v24 = vrot.slane %v1206_v62, 1 }
 0x21d   : > { %v1209_v53 = vsel %vm1180_vm10, %v2883_v51, -inf }
 0x21e   : > { %v1210_v6 = vrot.slane %v1209_v53, 4  ;;  %v1218_v11 = vmax.f32 %v1216_v49, %v1217_v50  ;;  %v1200_v54 = vrot.slane %v1199_v4, 1  ;;  %v1208_v39 = vmax.f32 %v1206_v62, %v1207_v24 }
 0x220   : > { %v1211_v12 = vmax.f32 %v1209_v53, %v1210_v6  ;;  %v1219_v1 = vrot.slane %v1218_v11, 2  ;;  %v1201_v18 = vmax.f32 %v1199_v4, %v1200_v54 }
 0x222   : > { %v1212_v57 = vrot.slane %v1211_v12, 2  ;;  %v2887_v59 = vpop.f32.mrf.mxu1  ;;  %v1220_v26 = vmax.f32 %v1218_v11, %v1219_v1  ;;  %v1246_v33 = vsel %vm508_vm3, %v1201_v18, %v1245_v31 }
 0x223   : > { %v1230_v2 = vsel %vm1180_vm10, %v2887_v59, -inf  ;;  %v1247_v42 = vsel %vm511_vm4, %v1208_v39, %v1246_v33 }
 0x224   : > { %v1213_v9 = vmax.f32 %v1211_v12, %v1212_v57  ;;  %v1231_v14 = vrot.slane %v1230_v2, 4  ;;  %v2891_v15 = vpop.f32.mrf.mxu1  ;;  %v1221_v40 = vrot.slane %v1220_v26, 1 }
 0x225   : > { %v1223_v17 = vsel %vm1180_vm10, %v2891_v15, -inf }
 0x226   : > { %v1214_v19 = vrot.slane %v1213_v9, 1  ;;  %v1232_v21 = vmax.f32 %v1230_v2, %v1231_v14  ;;  %v1224_v22 = vrot.slane %v1223_v17, 4  ;;  %v1222_v48 = vmax.f32 %v1220_v26, %v1221_v40 }
 0x228   : > { %v1233_v29 = vrot.slane %v1232_v21, 2  ;;  %v1225_v30 = vmax.f32 %v1223_v17, %v1224_v22  ;;  %v1215_v34 = vmax.f32 %v1213_v9, %v1214_v19 }
 0x22a   : > { %v1234_v36 = vmax.f32 %v1232_v21, %v1233_v29  ;;  %v1226_v38 = vrot.slane %v1225_v30, 2  ;;  %v1248_v44 = vsel %vm514_vm5, %v1215_v34, %v1247_v42 }
 0x22b   : > { %v1249_v52 = vsel %vm517_vm6, %v1222_v48, %v1248_v44 }
 0x22c   : > { %v1227_v41 = vmax.f32 %v1225_v30, %v1226_v38  ;;  %v1235_v43 = vrot.slane %v1234_v36, 1 }
 0x22e   : > { %v1228_v47 = vrot.slane %v1227_v41, 1  ;;  %v1236_v50 = vmax.f32 %v1234_v36, %v1235_v43 }
 0x230   : > { %v1229_v49 = vmax.f32 %v1227_v41, %v1228_v47 }
 0x232   : > { %v1250_v53 = vsel %vm520_vm7, %v1229_v49, %v1249_v52 }
 0x233   : > { %v1251_v4 = vsel %vm523_vm8, %v1236_v50, %v1250_v53 }
 0x234   : > { %v1253_v6 = vmax.f32 %v2861_v63, %v1251_v4 }
 0x236   : > { %v1254_v7 = vsub.f32 %v2861_v63, %v1253_v6  ;;  %v1258_v8 = vcombine.high %v1253_v6, %v1253_v6  ;;  %v1265_v11 = vrot.slane %v1253_v6, %v2789_v58 }
 0x238   : > { %v1255_v12 = vmul.f32 1.442695, %v1254_v7  ;;  %v1272_v13 = vrot.slane %v1258_v8, %v2789_v58  ;;  %v1273_v54 = vcombine.high %v1265_v11, %v1265_v11  ;;  %v1281_v57 = vrot.slane %v1265_v11, %v2789_v58 }
 0x23a   : > { %2243 = vpow2.f32 %v1255_v12  ;;  %v1274_v60 = vcombine.high %v1272_v13, %v1272_v13  ;;  %v1288_v62 = vrot.slane %v1272_v13, %v2789_v58  ;;  %v1295_v1 = vrot.slane %v1273_v54, %v2789_v58 }
 0x23b   : > { %v1303_v2 = vcombine.high %v1281_v57, %v1281_v57  ;;  %v1310_v9 = vrot.slane %v1281_v57, %v2801_v10 }
 0x23c   : > { %v1302_v63 = vrot.slane %v1274_v60, %v2789_v58  ;;  %v1304_v14 = vcombine.high %v1288_v62, %v1288_v62  ;;  %v1305_v16 = vcombine.high %v1295_v1, %v1295_v1  ;;  %v1314_v17 = vrot.slane %v1295_v1, %v2801_v10 }
 0x23d   : > { %v1318_v18 = vrot.slane %v1303_v2, %v2801_v10  ;;  %v1326_v19 = vrot.slane %v1288_v62, %v2801_v10  ;;  %v1347_v21 = vsub.f32 %v2865_v0, %v1310_v9 }
 0x23e   : > { %v1306_v22 = vcombine.high %v1302_v63, %v1302_v63  ;;  %v1322_v23 = vrot.slane %v1305_v16, %v2801_v10  ;;  %v1330_v24 = vrot.slane %v1302_v63, %v2801_v10  ;;  %v1334_v26 = vrot.slane %v1304_v14, %v2801_v10 }
 0x23f   : > { %v1348_v29 = vsub.f32 %v2863_v27, %v1314_v17  ;;  %v1349_v58 = vsub.f32 %v2875_v35, %v1318_v18  ;;  %v1351_v30 = vsub.f32 %v2883_v51, %v1326_v19  ;;  %v1355_v31 = vmul.f32 1.442695, %v1347_v21 }
 0x240   : > { %v1338_v33 = vrot.slane %v1306_v22, %v2801_v10  ;;  %v1350_v34 = vsub.f32 %v2871_v32, %v1322_v23  ;;  %v1352_v0 = vsub.f32 %v2879_v45, %v1330_v24  ;;  %v1353_v36 = vsub.f32 %v2891_v15, %v1334_v26 }
 0x241   : > { %2245 = vpow2.f32 %v1355_v31  ;;  %v1357_v38 = vmul.f32 1.442695, %v1348_v29  ;;  %v1359_v39 = vmul.f32 1.442695, %v1349_v58  ;;  %v1363_v27 = vmul.f32 1.442695, %v1351_v30 }
 0x242   : > { %v1354_v40 = vsub.f32 %v2887_v59, %v1338_v33  ;;  %v1361_v41 = vmul.f32 1.442695, %v1350_v34  ;;  %v1365_v35 = vmul.f32 1.442695, %v1352_v0  ;;  %v1367_v51 = vmul.f32 1.442695, %v1353_v36 }
 0x243   : > { %2247 = vpow2.f32 %v1357_v38 }
 0x244   : > { %2249 = vpow2.f32 %v1359_v39  ;;  %v1369_v42 = vmul.f32 1.442695, %v1354_v40 }
 0x245   : > { %2251 = vpow2.f32 %v1361_v41 }
 0x246   : > { %2253 = vpow2.f32 %v1363_v27 }
 0x247   : > { %v2926_v10 = vpop.eup %2243  ;;  %2255 = vpow2.f32 %v1365_v35 }
 0x248   : > { %2257 = vpow2.f32 %v1367_v51  ;;  %2150 = vmatmul.mubr.msk.f32.vlgmr.msra.gmra.mxu0 %vm1180_vm10, %v2926_v10 }
 0x249   : > { %2259 = vpow2.f32 %v1369_v42  ;;  %2153 = vmatpush3.msk.msra.mxu0 %vm1447_vm9, %v2853_v25 }
 0x24e   : > { %v2246_v32 = vpop.eup %2245 }
 0x24f   : > { %v1371_v45 = vsel %vm1180_vm10, %v2246_v32, 0.0  ;;  %2154 = vmatprep.mubr.msk.f32.mxu0 %vm1180_vm10, %v2246_v32 }
 0x250   : > { %v2248_v59 = vpop.eup %2247  ;;  %v1372_v15 = vrot.slane %v1371_v45, 4 }
 0x251   : > { %v2250_v43 = vpop.eup %2249  ;;  %v1378_v44 = vsel %vm1180_vm10, %v2248_v59, 0.0  ;;  %2155 = vmatmul.mubr.msk.f32.vlgmr.msra.gmra.mxu0 %vm1180_vm10, %v2248_v59 }
 0x252   : > { %v2252_v47 = vpop.eup %2251  ;;  %v1373_v48 = vadd.f32 %v1372_v15, %v1371_v45  ;;  %v1379_v49 = vrot.slane %v1378_v44, 4  ;;  %v1385_v50 = vsel %vm1180_vm10, %v2250_v43, 0.0  ;;  %2157 = vmatprep.mubr.msk.f32.mxu0 %vm1180_vm10, %v2250_v43 }
 0x253   : > { %v2254_v25 = vpop.eup %2253  ;;  %v1386_v52 = vrot.slane %v1385_v50, 4  ;;  %v1392_v53 = vsel %vm1180_vm10, %v2252_v47, 0.0 }
 0x254   : > { %v2256_v4 = vpop.eup %2255  ;;  %v1374_v6 = vrot.slane %v1373_v48, 2  ;;  %v1380_v7 = vadd.f32 %v1379_v49, %v1378_v44  ;;  %v1393_v8 = vrot.slane %v1392_v53, 4  ;;  %v1399_v11 = vsel %vm1180_vm10, %v2254_v25, 0.0 }
 0x255   : > { %v2258_v12 = vpop.eup %2257  ;;  %v1387_v13 = vadd.f32 %v1386_v52, %v1385_v50  ;;  %v1400_v54 = vrot.slane %v1399_v11, 4  ;;  %v1406_v57 = vsel %vm1180_vm10, %v2256_v4, 0.0  ;;  %2158 = vmatmul.mubr.msk.f32.gmra.mxu0 %vm1180_vm10, %v2252_v47 }
 0x256   : > { %v2260_v60 = vpop.eup %2259  ;;  %v1375_v62 = vadd.f32 %v1374_v6, %v1373_v48  ;;  %v1381_v1 = vrot.slane %v1380_v7, 2  ;;  %v1394_v2 = vadd.f32 %v1393_v8, %v1392_v53  ;;  %v1407_v9 = vrot.slane %v1406_v57, 4  ;;  %2160 = vmatprep.mubr.msk.f32.mxu0 %vm1180_vm10, %v2254_v25 }
 0x257   : > { %v1388_v63 = vrot.slane %v1387_v13, 2  ;;  %v1401_v14 = vadd.f32 %v1400_v54, %v1399_v11  ;;  %v1413_v16 = vsel %vm1180_vm10, %v2258_v12, 0.0  ;;  %v1420_v17 = vsel %vm1180_vm10, %v2260_v60, 0.0 }
 0x258   : > { %v1376_v18 = vrot.slane %v1375_v62, 1  ;;  %v1382_v19 = vadd.f32 %v1381_v1, %v1380_v7  ;;  %v1395_v21 = vrot.slane %v1394_v2, 2  ;;  %v1408_v22 = vadd.f32 %v1407_v9, %v1406_v57  ;;  %v2962_v57 = vld [vmem:[%s3048_s7] ss:$0 sm:$0xff] }
 0x259   : > { %v1389_v23 = vadd.f32 %v1388_v63, %v1387_v13  ;;  %v1402_v24 = vrot.slane %v1401_v14, 2  ;;  %v1414_v26 = vrot.slane %v1413_v16, 4  ;;  %v1421_v29 = vrot.slane %v1420_v17, 4  ;;  %2161 = vmatmul.mubr.msk.f32.gmra.mxu0 %vm1180_vm10, %v2256_v4 }
 0x25a   : > { %v1383_v58 = vrot.slane %v1382_v19, 1  ;;  %v1396_v30 = vadd.f32 %v1395_v21, %v1394_v2  ;;  %v1409_v31 = vrot.slane %v1408_v22, 2  ;;  %2163 = vmatprep.mubr.msk.f32.mxu0 %vm1180_vm10, %v2258_v12  ;;  %v1377_v38 = vadd.f32 %v1376_v18, %v1375_v62 }
 0x25b   : > { %v1390_v33 = vrot.slane %v1389_v23, 1  ;;  %v1403_v34 = vadd.f32 %v1402_v24, %v1401_v14  ;;  %v1415_v0 = vadd.f32 %v1414_v26, %v1413_v16  ;;  %v1422_v36 = vadd.f32 %v1421_v29, %v1420_v17 }
 0x25c   : > { %v1384_v39 = vadd.f32 %v1383_v58, %v1382_v19  ;;  %v1397_v40 = vrot.slane %v1396_v30, 1  ;;  %v1410_v41 = vadd.f32 %v1409_v31, %v1408_v22  ;;  %v836_v1 = vadd.f32 %v2962_v57, %v2791_v61 }
 0x25d   : > { %v1391_v27 = vadd.f32 %v1390_v33, %v1389_v23  ;;  %v1404_v35 = vrot.slane %v1403_v34, 1  ;;  %v1416_v51 = vrot.slane %v1415_v0, 2  ;;  %v1423_v42 = vrot.slane %v1422_v36, 2  ;;  %2164 = vmatmul.mubr.msk.f32.gmra.mxu0 %vm1180_vm10, %v2260_v60 }
 0x25e   : > { %v1398_v32 = vadd.f32 %v1397_v40, %v1396_v30  ;;  %v1411_v45 = vrot.slane %v1410_v41, 1  ;;  %v1435_v59 = vsel %vm505_vm2, %v1384_v39, %v1377_v38  ;;  %v841_v60 = vadd.f32 %v2962_v57, %v2799_v3 }
 0x25f   : > { %v1405_v15 = vadd.f32 %v1404_v35, %v1403_v34  ;;  %v1417_v43 = vadd.f32 %v1416_v51, %v1415_v0  ;;  %v1424_v44 = vadd.f32 %v1423_v42, %v1422_v36  ;;  %v1436_v47 = vsel %vm508_vm3, %v1391_v27, %v1435_v59 }
 0x260   : > { %v1412_v48 = vadd.f32 %v1411_v45, %v1410_v41  ;;  %v1437_v49 = vsel %vm511_vm4, %v1398_v32, %v1436_v47  ;;  %v851_v9 = vadd.f32 %v2962_v57, %v2813_v28  ;;  %v846_v18 = vadd.f32 %v2962_v57, %v2805_v20 }
 0x261   : > { %v1418_v50 = vrot.slane %v1417_v43, 1  ;;  %v1425_v25 = vrot.slane %v1424_v44, 1  ;;  %v1438_v52 = vsel %vm514_vm5, %v1405_v15, %v1437_v49  ;;  %v861_v61 = vadd.f32 %v2962_v57, %v2824_v46 }
 0x262   : > { %v1439_v53 = vsel %vm517_vm6, %v1412_v48, %v1438_v52  ;;  %v856_v31 = vadd.f32 %v2962_v57, %v2818_v37  ;;  %v871_v46 = vadd.f32 %v2962_v57, %v2836_v55  ;;  %v866_v37 = vadd.f32 %v2962_v57, %v2830_v5 }
 0x263   : > { %v1419_v4 = vadd.f32 %v1418_v50, %v1417_v43  ;;  %v1426_v6 = vadd.f32 %v1425_v25, %v1424_v44 }
 0x265   : > { %v1440_v7 = vsel %vm520_vm7, %v1419_v4, %v1439_v53 }
 0x266   : > { %v1441_v8 = vsel %vm523_vm8, %v1426_v6, %v1440_v7 }
 0x267   : > { %v1443_v11 = vadd.f32 %v2926_v10, %v1441_v8 }
 0x269   : > { %2261 = vrcp.f32 %v1443_v11 }
 0x276   : > { %v2262_v12 = vpop.eup %2261 }
 0x277   : > { %2169 = vmatmul.mubr.msk.f32.vlgmr.msra.gmra.mxu1 %vm1180_vm10, %v2262_v12 }
 0x308   : > { %v2957_v13 = vpop.f32.mrf.mxu0 }
 0x30a   : > { %v2151_v54 = vpop.f32.mrf.mxu0 }
 0x311   : > { %v2156_v62 = vpop.f32.mrf.mxu0 }
 0x312   : > { %v1726_v10 = vmul.f32 %v2156_v62, %v841_v60 }
 0x313   : > { %v1611_v2 = vpop.f32.mrf.mxu0 }
 0x314   : > { %v1740_v63 = vsel %vm416_vm1, %v1726_v10, 0.0  ;;  %v1725_v14 = vmul.f32 %v1611_v2, %v836_v1 }
 0x315   : > { %v1741_v16 = vrot.slane %v1740_v63, 4  ;;  %v2159_v17 = vpop.f32.mrf.mxu0 }
 0x316   : > { %v1733_v19 = vsel %vm416_vm1, %v1725_v14, 0.0  ;;  %v1728_v3 = vmul.f32 %v2159_v17, %v851_v9 }
 0x317   : > { %v1742_v21 = vadd.f32 %v1741_v16, %v1740_v63  ;;  %v1734_v22 = vrot.slane %v1733_v19, 4  ;;  %v1621_v23 = vpop.f32.mrf.mxu0 }
 0x318   : > { %v1754_v24 = vsel %vm416_vm1, %v1728_v3, 0.0  ;;  %v1727_v28 = vmul.f32 %v1621_v23, %v846_v18 }
 0x319   : > { %v1743_v26 = vrot.slane %v1742_v21, 2  ;;  %v1735_v29 = vadd.f32 %v1734_v22, %v1733_v19  ;;  %v1755_v58 = vrot.slane %v1754_v24, 4  ;;  %v2162_v30 = vpop.f32.mrf.mxu0 }
 0x31a   : > { %v1747_v20 = vsel %vm416_vm1, %v1727_v28, 0.0  ;;  %v1730_v33 = vmul.f32 %v2162_v30, %v861_v61  ;;  %v831_v30 = vadd.f32 %v2962_v57, %v2787_v56 }
 0x31b   : > { %v1744_v34 = vadd.f32 %v1743_v26, %v1742_v21  ;;  %v1736_v0 = vrot.slane %v1735_v29, 2  ;;  %v1756_v36 = vadd.f32 %v1755_v58, %v1754_v24  ;;  %v1748_v38 = vrot.slane %v1747_v20, 4  ;;  %v1631_v39 = vpop.f32.mrf.mxu0 }
 0x31c   : > { %v1768_v40 = vsel %vm416_vm1, %v1730_v33, 0.0  ;;  %v1729_v41 = vmul.f32 %v1631_v39, %v856_v31  ;;  %v1724_v33 = vmul.f32 %v2957_v13, %v831_v30 }
 0x31d   : > { %v1745_v27 = vrot.slane %v1744_v34, 1  ;;  %v1737_v35 = vadd.f32 %v1736_v0, %v1735_v29  ;;  %v1757_v51 = vrot.slane %v1756_v36, 2  ;;  %v1749_v42 = vadd.f32 %v1748_v38, %v1747_v20  ;;  %v2165_v32 = vpop.f32.mrf.mxu0 }
 0x31e   : > { %v1769_v45 = vrot.slane %v1768_v40, 4  ;;  %v1761_v59 = vsel %vm416_vm1, %v1729_v41, 0.0  ;;  %v1732_v15 = vmul.f32 %v2165_v32, %v871_v46 }
 0x31f   : > { %v1738_v43 = vrot.slane %v1737_v35, 1  ;;  %v1758_v44 = vadd.f32 %v1757_v51, %v1756_v36  ;;  %v1750_v47 = vrot.slane %v1749_v42, 2  ;;  %v1641_v48 = vpop.f32.mrf.mxu0  ;;  %v1762_v49 = vrot.slane %v1761_v59, 4 }
 0x320   : > { %v1770_v55 = vadd.f32 %v1769_v45, %v1768_v40  ;;  %v1782_v50 = vsel %vm416_vm1, %v1732_v15, 0.0  ;;  %v1731_v25 = vmul.f32 %v1641_v48, %v866_v37  ;;  %v1746_v52 = vadd.f32 %v1745_v27, %v1744_v34 }
 0x321   : > { %v1739_v53 = vadd.f32 %v1738_v43, %v1737_v35  ;;  %v1751_v4 = vadd.f32 %v1750_v47, %v1749_v42  ;;  %v1783_v6 = vrot.slane %v1782_v50, 4  ;;  %v1759_v7 = vrot.slane %v1758_v44, 1 }
 0x322   : > { %v1771_v8 = vrot.slane %v1770_v55, 2  ;;  %v1763_v5 = vadd.f32 %v1762_v49, %v1761_v59  ;;  %v1775_v11 = vsel %vm416_vm1, %v1731_v25, 0.0 }
 0x323   : > { %v1797_v12 = vsel %vm505_vm2, %v1746_v52, %v1739_v53  ;;  %v1752_v54 = vrot.slane %v1751_v4, 1  ;;  %v1784_v60 = vadd.f32 %v1783_v6, %v1782_v50  ;;  %v1776_v10 = vrot.slane %v1775_v11, 4 }
 0x324   : > { %v1772_v62 = vadd.f32 %v1771_v8, %v1770_v55  ;;  %v1764_v1 = vrot.slane %v1763_v5, 2  ;;  %v1760_v63 = vadd.f32 %v1759_v7, %v1758_v44 }
 0x325   : > { %v1753_v2 = vadd.f32 %v1752_v54, %v1751_v4  ;;  %v1785_v9 = vrot.slane %v1784_v60, 2  ;;  %v1777_v16 = vadd.f32 %v1776_v10, %v1775_v11 }
 0x326   : > { %v1765_v14 = vadd.f32 %v1764_v1, %v1763_v5  ;;  %v1773_v18 = vrot.slane %v1772_v62, 1 }
 0x327   : > { %v1798_v17 = vsel %vm508_vm3, %v1753_v2, %v1797_v12  ;;  %v1786_v19 = vadd.f32 %v1785_v9, %v1784_v60  ;;  %v1778_v21 = vrot.slane %v1777_v16, 2 }
 0x328   : > { %v1766_v3 = vrot.slane %v1765_v14, 1  ;;  %v1799_v22 = vsel %vm511_vm4, %v1760_v63, %v1798_v17  ;;  %v1774_v24 = vadd.f32 %v1773_v18, %v1772_v62 }
 0x329   : > { %v1779_v61 = vadd.f32 %v1778_v21, %v1777_v16  ;;  %v1787_v28 = vrot.slane %v1786_v19, 1 }
 0x32a   : > { %v1767_v23 = vadd.f32 %v1766_v3, %v1765_v14 }
 0x32b   : > { %v1780_v26 = vrot.slane %v1779_v61, 1  ;;  %v1788_v20 = vadd.f32 %v1787_v28, %v1786_v19 }
 0x32c   : > { %v1800_v29 = vsel %vm514_vm5, %v1767_v23, %v1799_v22 }
 0x32d   : > { %v1801_v58 = vsel %vm517_vm6, %v1774_v24, %v1800_v29  ;;  %v1781_v31 = vadd.f32 %v1780_v26, %v1779_v61 }
 0x32f   : > { %v1802_v34 = vsel %vm520_vm7, %v1781_v31, %v1801_v58 }
 0x330   : > { %v1803_v0 = vsel %vm523_vm8, %v1788_v20, %v1802_v34 }
 0x331   : > { %v1805_v36 = vadd.f32 %v1803_v0, %v1724_v33 }
 0x337   : > { %v1720_v38 = vpop.f32.mrf.mxu1 }
 0x338   : > { %v1806_v39 = vmul.f32 %v1805_v36, %v1720_v38 }
 0x339   : > { %v2170_v56 = vpop.f32.mrf.mxu1 }
 0x33a   : > { %1807 = vst.msk [vmem:[%s406_s3] sm:$0xff] %vm416_vm1, %v1806_v39 }
 0x33b   : > { %2356 = shalt.err (!%p2353_p3)
}
 0x33c   : > { %s2357_s4 = scalar_lea.hbm %s3003_s29, 128  ;;  %s2361_s15 = scalar_lea.hbm %s3051_s10, 256 }
 0x33d   : > { %p2358_p11 = scmp.ne.s32.totalorder %s3003_s29, %s2357_s4  ;;  %p2362_p4 = scmp.lt.s32.totalorder %s3003_s29, %s3051_s10 }
 0x33e   : > { %p2363_p6 = scmp.lt.s32.totalorder %s2361_s15, %s2357_s4 }
 0x33f   : > { %p2359_p9 = pnand %p2358_p11, %p3077_p2 }
 0x340   : > { %p2364_p8 = por %p2363_p6, %p2362_p4 }
 0x341   : > { %p2360_p1 = pneg %p2359_p9 }
 0x343   : > { %p2365_p5 = pnand %p2364_p8, %p2360_p1 }
 0x345   : > { %2368 = shalt.err (!%p2365_p5)
}
 0x346   : > { %2181 = dma.vmem_to_hbm [thread:$0]  (%p3077_p2), %s1823_s19, 128, %s3003_s29, %s1809_s24  }
 0x347 PF: > { %s1834_s3 = sand.u32 1, %s2399_s13   ;;  %p3078_p7 = scmp.ne.s32.totalorder %s3063_s20, 0 }
 0x348   : > { %p3079_p12 = scmp.ge.s32.totalorder %s2411_s16, 2  ;;  %s1835_s21 = scalar_lea.sflag [#allocation4], %s1834_s3 }
 0x34a   : > { %p2195_p13 = pnand %p3079_p12, %p3078_p7 }
 0x34c   : > { %p2196_p0 = pneg %p2195_p13 }
 0x34e   : > { %2394 = dma.done.wait (%p2196_p0), %s1835_s21, 128  }
 0x34f   : > { %2396 = vsyncadd (%p2196_p0), %s1835_s21, 4294967168  ;;  %s3080_s28 = sld [smem:[#allocation12_spill]]  ;;  %p24_p10 = scmp.ge.s32.totalorder %s2555_s23, 4  }
 0x350   : > { %s3081_s15 = sld [smem:[#allocation13_spill]]  ;;  %s3082_s13 = smov %s2403_s14 }
 0x351   : > { %s3084_s16 = smov %s2555_s23  ;;  %26 = sbr.rel (!%p24_p10) target bundleno = 9 (0x9), region = 113 }
 0x355   : > { %s3083_s14 = smov %s3080_s28 }
 0x356   :  { %1840 = vsyncpa [#allocation3], 1 }
 0x357   :  { %1842 = vsyncpa [#allocation3 + $0x1], 1 }
 0x358   :  { %1843 = vsyncpa [#allocation6], 1 }
 0x359   :  { %1844 = vsyncpa [#allocation4], 1 }
 0x35a   :  { %1846 = vsyncpa [#allocation4 + $0x1], 1 }

</bundles_post_ra>
